<compile_context>
chip_gen: v5e
topology: v5e:2x2
jax: 0.10.0
libtpu: 0.0.40
codegen_flags: <defaults>
</compile_context>

<pallas_src>
import jax
import jax.numpy as jnp
from jax.experimental import pallas as pl
from jax.experimental.pallas import tpu as pltpu

IMAGE_SIZE = (1, 28, 28)
IN_DIM = 1 * 28 * 28  # 784
LAYER_DIMS = [(IN_DIM, 512), (512, 256), (256, 128), (128, 64), (64, 32), (32, 1)]
_PACK_ROWS = 8    # sublane-padded pack: rows 0..5 biases, row 6 = final weight col
_PACK_COLS = 512  # widest layer, lane-padded
_SQRT_2_OVER_PI = 0.7978845608028654


def _gelu_tanh(x):
    # torch.nn.GELU(approximate='tanh'): tanh lowers to the EUP (free bundle
    # slot) instead of the f32 erf polynomial on the VALU.
    return 0.5 * x * (1.0 + jnp.tanh(_SQRT_2_OVER_PI * (x + 0.044715 * x * x * x)))


def _round_up(x, m):
    return (x + m - 1) // m * m


def _cdiv(a, b):
    return (a + b - 1) // b


def discriminator_kernel(x_ref, w1, w2, w3, w4, w5, misc_ref, o_ref):
    """x_ref:  [TB, 784] f32 activation tile (the only streamed operand)
    w1..w5:    [in, out] bf16 weights, VMEM-resident (constant index maps)
    misc_ref:  [8, 512] f32: rows 0..5 = biases, row 6[:32] = final Linear(32,1) weight
    o_ref:     [TB, 1] f32 probabilities."""
    w_refs = (w1, w2, w3, w4, w5)
    h = x_ref[...].astype(jnp.bfloat16)  # fold the f32->bf16 cast into the kernel
    for j in range(5):
        fan_out = LAYER_DIMS[j][1]
        acc = jnp.dot(h, w_refs[j][...], preferred_element_type=jnp.float32)
        acc = acc + misc_ref[j:j + 1, :fan_out]        # static slice, f32 bias
        h = _gelu_tanh(acc).astype(jnp.bfloat16)       # bf16 back into the MXU
    # Final Linear(32,1): degenerate matmul (1 useful output lane) done on the
    # VPU + XLU instead of the MXU: multiply by the f32 weight row, reduce lanes.
    w_last = misc_ref[6:7, :32]                                        # [1, 32] f32
    logit = jnp.sum(h.astype(jnp.float32) * w_last, axis=-1, keepdims=True)
    logit = logit + misc_ref[5:6, :1]                                  # final bias
    o_ref[...] = jax.nn.sigmoid(logit).astype(o_ref.dtype)


def init_params(key):
    """PyTorch-style U(-1/sqrt(fan_in), 1/sqrt(fan_in)) init.
    Weights stored pre-transposed as [in, out] so the kernel does x @ W_t + b."""
    params = []
    for (fan_in, fan_out) in LAYER_DIMS:
        key, kw, kb = jax.random.split(key, 3)
        bound = 1.0 / jnp.sqrt(float(fan_in))
        w_t = jax.random.uniform(kw, (fan_in, fan_out), jnp.float32,
                                 minval=-bound, maxval=bound)
        b = jax.random.uniform(kb, (fan_out,), jnp.float32,
                               minval=-bound, maxval=bound)
        params.append((w_t, b))
    return params


def prepare_params(params):
    """ONE-TIME packing (call when params are created/updated, NOT per forward):
    bf16 weights for layers 0..4 plus a single [8, 512] f32 pack holding the six
    biases (rows 0..5) and the final Linear(32,1) weight column (row 6)."""
    w_bf16 = tuple(w.astype(jnp.bfloat16) for (w, _) in params[:5])
    misc = jnp.zeros((_PACK_ROWS, _PACK_COLS), jnp.float32)
    for j, (_, b) in enumerate(params):
        misc = misc.at[j, : b.shape[0]].set(b)
    misc = misc.at[6, :32].set(params[5][0].reshape(-1))   # final weight column
    return w_bf16, misc


def _choose_batch_tile(batch):
    # ~B/2 per tile (>=2 grid steps whenever B>8 so the "parallel" axis shards
    # across both v7x TensorCores), capped at 1024 rows to amortize per-step
    # overhead while keeping the double-buffered f32 input tile + resident
    # weights + f32 intermediates (~15 MB) well inside every generation's VMEM.
    half = _round_up(max(1, (batch + 1) // 2), 8)
    return max(8, min(1024, half))


def discriminator_forward(image, packed_params, *, batch_tile=None, interpret=False):
    """image: [B, 1, 28, 28] float32 (NCHW).  packed_params: prepare_params(...) output.
    Returns probs [B, 1] float32."""
    w_bf16, misc = packed_params
    B = image.shape[0]
    x = image.reshape(B, -1)                 # f32 [B, 784]; bf16 cast happens in-kernel

    tb = batch_tile or _choose_batch_tile(B)
    nb = _cdiv(B, tb)                        # partial trailing block: OOB rows discarded

    const_blk = lambda i: (0, 0)             # weights/pack: fetched once, VMEM-resident
    in_specs = [pl.BlockSpec((tb, IN_DIM), lambda i: (i, 0))]
    in_specs += [pl.BlockSpec(w.shape, const_blk) for w in w_bf16]
    in_specs += [pl.BlockSpec((_PACK_ROWS, _PACK_COLS), const_blk)]

    total_mac = sum(fi * fo for fi, fo in LAYER_DIMS)
    n_act = sum(fo for _, fo in LAYER_DIMS)
    weight_bytes = 2 * sum(fi * fo for fi, fo in LAYER_DIMS[:5])   # bf16 weights
    cost = pl.CostEstimate(
        flops=2 * B * total_mac,
        transcendentals=B * n_act,
        bytes_accessed=(B * IN_DIM * 4                 # f32 input (cast in-kernel)
                        + weight_bytes                 # bf16 weights
                        + _PACK_ROWS * _PACK_COLS * 4  # f32 bias/last-weight pack
                        + B * 4),                      # f32 output
    )

    out = pl.pallas_call(
        discriminator_kernel,
        out_shape=jax.ShapeDtypeStruct((B, 1), jnp.float32),
        grid=(nb,),
        in_specs=in_specs,
        out_specs=pl.BlockSpec((tb, 1), lambda i: (i, 0)),
        compiler_params=pltpu.CompilerParams(
            dimension_semantics=("parallel",),         # megacore sharding on v7x
            vmem_limit_bytes=32 * 1024 * 1024,         # enough for TB=1024, safe on v7x
        ),
        cost_estimate=cost,
        interpret=interpret,
    )(x, *w_bf16, misc)

    return out


def discriminator_ref(image, params):
    """Pure-JAX reference mirroring the kernel's mixed precision and GELU form."""
    h = image.reshape(image.shape[0], -1).astype(jnp.bfloat16)
    for (w, b) in params[:5]:
        acc = jnp.dot(h, w.astype(jnp.bfloat16),
                      preferred_element_type=jnp.float32) + b
        h = _gelu_tanh(acc).astype(jnp.bfloat16)
    w6, b6 = params[5]
    logit = jnp.sum(h.astype(jnp.float32) * w6.reshape(1, -1),
                    axis=-1, keepdims=True) + b6
    return jax.nn.sigmoid(logit)


if __name__ == "__main__":
    key = jax.random.PRNGKey(0)
    k_param, k_img = jax.random.split(key)

    params = init_params(k_param)
    packed = prepare_params(params)   # one-time packing, hoisted out of the forward

    B = 16                            # small batch; yields 2 grid steps (tb = 8)
    image = jax.random.normal(k_img, (B,) + IMAGE_SIZE, dtype=jnp.float32)

    probs = jax.block_until_ready(discriminator_forward(image, packed))
    ref = jax.block_until_ready(discriminator_ref(image, params))

    assert probs.shape == (B, 1), probs.shape
    assert bool(jnp.all(jnp.isfinite(probs))), "non-finite output"
    assert jnp.allclose(probs, ref, atol=2e-3, rtol=2e-3), (
        "Pallas kernel output mismatch vs bf16 JAX reference; max abs diff = "
        + str(float(jnp.max(jnp.abs(probs - ref)))))

    print("KERNEL_OK")
</pallas_src>

<mosaic_0001>
module attributes {stable_mosaic.version = 11 : i64} {
  func.func @discriminator_kernel(%arg0: i32, %arg1: memref<8x784xf32, #tpu.memory_space<vmem>>, %arg2: memref<784x512xbf16, #tpu.memory_space<vmem>>, %arg3: memref<512x256xbf16, #tpu.memory_space<vmem>>, %arg4: memref<256x128xbf16, #tpu.memory_space<vmem>>, %arg5: memref<128x64xbf16, #tpu.memory_space<vmem>>, %arg6: memref<64x32xbf16, #tpu.memory_space<vmem>>, %arg7: memref<8x512xf32, #tpu.memory_space<vmem>>, %arg8: memref<8x1xf32, #tpu.memory_space<vmem>>) attributes {dimension_semantics = [#tpu.dimension_semantics<parallel>], iteration_bounds = array<i64: 2>, scalar_prefetch = 0 : i64, scratch_operands = 0 : i64, tpu.core_type = #tpu.core_type<tc>, window_params = [{transform_indices = @transform_0, window_bounds = array<i64: 8, 784>}, {pipeline_mode = #tpu.pipeline_mode<synchronous>, transform_indices = @transform_1, window_bounds = array<i64: 784, 512>}, {pipeline_mode = #tpu.pipeline_mode<synchronous>, transform_indices = @transform_2, window_bounds = array<i64: 512, 256>}, {pipeline_mode = #tpu.pipeline_mode<synchronous>, transform_indices = @transform_3, window_bounds = array<i64: 256, 128>}, {pipeline_mode = #tpu.pipeline_mode<synchronous>, transform_indices = @transform_4, window_bounds = array<i64: 128, 64>}, {pipeline_mode = #tpu.pipeline_mode<synchronous>, transform_indices = @transform_5, window_bounds = array<i64: 64, 32>}, {pipeline_mode = #tpu.pipeline_mode<synchronous>, transform_indices = @transform_6, window_bounds = array<i64: 8, 512>}, {transform_indices = @transform_7, window_bounds = array<i64: 8, 1>}]} {
    %c0 = arith.constant 0 : index
    %c0_0 = arith.constant 0 : index
    %0 = vector.load %arg1[%c0, %c0_0] : memref<8x784xf32, #tpu.memory_space<vmem>>, vector<8x784xf32>
    %1 = arith.truncf %0 : vector<8x784xf32> to vector<8x784xbf16>
    %c0_1 = arith.constant 0 : index
    %c0_2 = arith.constant 0 : index
    %2 = vector.load %arg2[%c0_1, %c0_2] : memref<784x512xbf16, #tpu.memory_space<vmem>>, vector<784x512xbf16>
    %cst = arith.constant dense<0.000000e+00> : vector<8x512xf32>
    %3 = tpu.matmul %1, %2, %cst {dimension_numbers = #tpu.dot_dimension_numbers<[1], [0], [0], [1], [0, 0, 1, 1], [], []>} : vector<8x784xbf16>, vector<784x512xbf16>, vector<8x512xf32> -> vector<8x512xf32>
    %c0_3 = arith.constant 0 : index
    %c0_4 = arith.constant 0 : index
    %4 = vector.load %arg7[%c0_3, %c0_4] : memref<8x512xf32, #tpu.memory_space<vmem>>, vector<1x512xf32>
    %5 = vector.broadcast %4 : vector<1x512xf32> to vector<8x512xf32>
    %6 = arith.addf %3, %5 : vector<8x512xf32>
    %cst_5 = arith.constant 5.000000e-01 : f32
    %7 = vector.broadcast %cst_5 : f32 to vector<8x512xf32>
    %8 = arith.mulf %7, %6 : vector<8x512xf32>
    %cst_6 = arith.constant 4.471500e-02 : f32
    %9 = vector.broadcast %cst_6 : f32 to vector<8x512xf32>
    %10 = arith.mulf %9, %6 : vector<8x512xf32>
    %11 = arith.mulf %10, %6 : vector<8x512xf32>
    %12 = arith.mulf %11, %6 : vector<8x512xf32>
    %13 = arith.addf %6, %12 : vector<8x512xf32>
    %cst_7 = arith.constant 0.797884583 : f32
    %14 = vector.broadcast %cst_7 : f32 to vector<8x512xf32>
    %15 = arith.mulf %14, %13 : vector<8x512xf32>
    %16 = math.tanh %15 : vector<8x512xf32>
    %cst_8 = arith.constant 1.000000e+00 : f32
    %17 = vector.broadcast %cst_8 : f32 to vector<8x512xf32>
    %18 = arith.addf %17, %16 : vector<8x512xf32>
    %19 = arith.mulf %8, %18 : vector<8x512xf32>
    %20 = arith.truncf %19 : vector<8x512xf32> to vector<8x512xbf16>
    %c0_9 = arith.constant 0 : index
    %c0_10 = arith.constant 0 : index
    %21 = vector.load %arg3[%c0_9, %c0_10] : memref<512x256xbf16, #tpu.memory_space<vmem>>, vector<512x256xbf16>
    %cst_11 = arith.constant dense<0.000000e+00> : vector<8x256xf32>
    %22 = tpu.matmul %20, %21, %cst_11 {dimension_numbers = #tpu.dot_dimension_numbers<[1], [0], [0], [1], [0, 0, 1, 1], [], []>} : vector<8x512xbf16>, vector<512x256xbf16>, vector<8x256xf32> -> vector<8x256xf32>
    %c1 = arith.constant 1 : index
    %c0_12 = arith.constant 0 : index
    %23 = vector.load %arg7[%c1, %c0_12] : memref<8x512xf32, #tpu.memory_space<vmem>>, vector<1x256xf32>
    %24 = vector.broadcast %23 : vector<1x256xf32> to vector<8x256xf32>
    %25 = arith.addf %22, %24 : vector<8x256xf32>
    %cst_13 = arith.constant 5.000000e-01 : f32
    %26 = vector.broadcast %cst_13 : f32 to vector<8x256xf32>
    %27 = arith.mulf %26, %25 : vector<8x256xf32>
    %cst_14 = arith.constant 4.471500e-02 : f32
    %28 = vector.broadcast %cst_14 : f32 to vector<8x256xf32>
    %29 = arith.mulf %28, %25 : vector<8x256xf32>
    %30 = arith.mulf %29, %25 : vector<8x256xf32>
    %31 = arith.mulf %30, %25 : vector<8x256xf32>
    %32 = arith.addf %25, %31 : vector<8x256xf32>
    %cst_15 = arith.constant 0.797884583 : f32
    %33 = vector.broadcast %cst_15 : f32 to vector<8x256xf32>
    %34 = arith.mulf %33, %32 : vector<8x256xf32>
    %35 = math.tanh %34 : vector<8x256xf32>
    %cst_16 = arith.constant 1.000000e+00 : f32
    %36 = vector.broadcast %cst_16 : f32 to vector<8x256xf32>
    %37 = arith.addf %36, %35 : vector<8x256xf32>
    %38 = arith.mulf %27, %37 : vector<8x256xf32>
    %39 = arith.truncf %38 : vector<8x256xf32> to vector<8x256xbf16>
    %c0_17 = arith.constant 0 : index
    %c0_18 = arith.constant 0 : index
    %40 = vector.load %arg4[%c0_17, %c0_18] : memref<256x128xbf16, #tpu.memory_space<vmem>>, vector<256x128xbf16>
    %cst_19 = arith.constant dense<0.000000e+00> : vector<8x128xf32>
    %41 = tpu.matmul %39, %40, %cst_19 {dimension_numbers = #tpu.dot_dimension_numbers<[1], [0], [0], [1], [0, 0, 1, 1], [], []>} : vector<8x256xbf16>, vector<256x128xbf16>, vector<8x128xf32> -> vector<8x128xf32>
    %c2 = arith.constant 2 : index
    %c0_20 = arith.constant 0 : index
    %42 = vector.load %arg7[%c2, %c0_20] : memref<8x512xf32, #tpu.memory_space<vmem>>, vector<1x128xf32>
    %43 = vector.broadcast %42 : vector<1x128xf32> to vector<8x128xf32>
    %44 = arith.addf %41, %43 : vector<8x128xf32>
    %cst_21 = arith.constant 5.000000e-01 : f32
    %45 = vector.broadcast %cst_21 : f32 to vector<8x128xf32>
    %46 = arith.mulf %45, %44 : vector<8x128xf32>
    %cst_22 = arith.constant 4.471500e-02 : f32
    %47 = vector.broadcast %cst_22 : f32 to vector<8x128xf32>
    %48 = arith.mulf %47, %44 : vector<8x128xf32>
    %49 = arith.mulf %48, %44 : vector<8x128xf32>
    %50 = arith.mulf %49, %44 : vector<8x128xf32>
    %51 = arith.addf %44, %50 : vector<8x128xf32>
    %cst_23 = arith.constant 0.797884583 : f32
    %52 = vector.broadcast %cst_23 : f32 to vector<8x128xf32>
    %53 = arith.mulf %52, %51 : vector<8x128xf32>
    %54 = math.tanh %53 : vector<8x128xf32>
    %cst_24 = arith.constant 1.000000e+00 : f32
    %55 = vector.broadcast %cst_24 : f32 to vector<8x128xf32>
    %56 = arith.addf %55, %54 : vector<8x128xf32>
    %57 = arith.mulf %46, %56 : vector<8x128xf32>
    %58 = arith.truncf %57 : vector<8x128xf32> to vector<8x128xbf16>
    %c0_25 = arith.constant 0 : index
    %c0_26 = arith.constant 0 : index
    %59 = vector.load %arg5[%c0_25, %c0_26] : memref<128x64xbf16, #tpu.memory_space<vmem>>, vector<128x64xbf16>
    %cst_27 = arith.constant dense<0.000000e+00> : vector<8x64xf32>
    %60 = tpu.matmul %58, %59, %cst_27 {dimension_numbers = #tpu.dot_dimension_numbers<[1], [0], [0], [1], [0, 0, 1, 1], [], []>} : vector<8x128xbf16>, vector<128x64xbf16>, vector<8x64xf32> -> vector<8x64xf32>
    %c3 = arith.constant 3 : index
    %c0_28 = arith.constant 0 : index
    %61 = vector.load %arg7[%c3, %c0_28] : memref<8x512xf32, #tpu.memory_space<vmem>>, vector<1x64xf32>
    %62 = vector.broadcast %61 : vector<1x64xf32> to vector<8x64xf32>
    %63 = arith.addf %60, %62 : vector<8x64xf32>
    %cst_29 = arith.constant 5.000000e-01 : f32
    %64 = vector.broadcast %cst_29 : f32 to vector<8x64xf32>
    %65 = arith.mulf %64, %63 : vector<8x64xf32>
    %cst_30 = arith.constant 4.471500e-02 : f32
    %66 = vector.broadcast %cst_30 : f32 to vector<8x64xf32>
    %67 = arith.mulf %66, %63 : vector<8x64xf32>
    %68 = arith.mulf %67, %63 : vector<8x64xf32>
    %69 = arith.mulf %68, %63 : vector<8x64xf32>
    %70 = arith.addf %63, %69 : vector<8x64xf32>
    %cst_31 = arith.constant 0.797884583 : f32
    %71 = vector.broadcast %cst_31 : f32 to vector<8x64xf32>
    %72 = arith.mulf %71, %70 : vector<8x64xf32>
    %73 = math.tanh %72 : vector<8x64xf32>
    %cst_32 = arith.constant 1.000000e+00 : f32
    %74 = vector.broadcast %cst_32 : f32 to vector<8x64xf32>
    %75 = arith.addf %74, %73 : vector<8x64xf32>
    %76 = arith.mulf %65, %75 : vector<8x64xf32>
    %77 = arith.truncf %76 : vector<8x64xf32> to vector<8x64xbf16>
    %c0_33 = arith.constant 0 : index
    %c0_34 = arith.constant 0 : index
    %78 = vector.load %arg6[%c0_33, %c0_34] : memref<64x32xbf16, #tpu.memory_space<vmem>>, vector<64x32xbf16>
    %cst_35 = arith.constant dense<0.000000e+00> : vector<8x32xf32>
    %79 = tpu.matmul %77, %78, %cst_35 {dimension_numbers = #tpu.dot_dimension_numbers<[1], [0], [0], [1], [0, 0, 1, 1], [], []>} : vector<8x64xbf16>, vector<64x32xbf16>, vector<8x32xf32> -> vector<8x32xf32>
    %c4 = arith.constant 4 : index
    %c0_36 = arith.constant 0 : index
    %80 = vector.load %arg7[%c4, %c0_36] : memref<8x512xf32, #tpu.memory_space<vmem>>, vector<1x32xf32>
    %81 = vector.broadcast %80 : vector<1x32xf32> to vector<8x32xf32>
    %82 = arith.addf %79, %81 : vector<8x32xf32>
    %cst_37 = arith.constant 5.000000e-01 : f32
    %83 = vector.broadcast %cst_37 : f32 to vector<8x32xf32>
    %84 = arith.mulf %83, %82 : vector<8x32xf32>
    %cst_38 = arith.constant 4.471500e-02 : f32
    %85 = vector.broadcast %cst_38 : f32 to vector<8x32xf32>
    %86 = arith.mulf %85, %82 : vector<8x32xf32>
    %87 = arith.mulf %86, %82 : vector<8x32xf32>
    %88 = arith.mulf %87, %82 : vector<8x32xf32>
    %89 = arith.addf %82, %88 : vector<8x32xf32>
    %cst_39 = arith.constant 0.797884583 : f32
    %90 = vector.broadcast %cst_39 : f32 to vector<8x32xf32>
    %91 = arith.mulf %90, %89 : vector<8x32xf32>
    %92 = math.tanh %91 : vector<8x32xf32>
    %cst_40 = arith.constant 1.000000e+00 : f32
    %93 = vector.broadcast %cst_40 : f32 to vector<8x32xf32>
    %94 = arith.addf %93, %92 : vector<8x32xf32>
    %95 = arith.mulf %84, %94 : vector<8x32xf32>
    %96 = arith.truncf %95 : vector<8x32xf32> to vector<8x32xbf16>
    %c6 = arith.constant 6 : index
    %c0_41 = arith.constant 0 : index
    %97 = vector.load %arg7[%c6, %c0_41] : memref<8x512xf32, #tpu.memory_space<vmem>>, vector<1x32xf32>
    %98 = arith.extf %96 : vector<8x32xbf16> to vector<8x32xf32>
    %99 = vector.broadcast %97 : vector<1x32xf32> to vector<8x32xf32>
    %100 = arith.mulf %98, %99 : vector<8x32xf32>
    %cst_42 = arith.constant dense<0.000000e+00> : vector<8xf32>
    %101 = vector.multi_reduction <add>, %100, %cst_42 [1] : vector<8x32xf32> to vector<8xf32>
    %102 = vector.shape_cast %101 : vector<8xf32> to vector<8x1xf32>
    %c5 = arith.constant 5 : index
    %c0_43 = arith.constant 0 : index
    %103 = vector.load %arg7[%c5, %c0_43] : memref<8x512xf32, #tpu.memory_space<vmem>>, vector<1x1xf32>
    %104 = vector.broadcast %103 : vector<1x1xf32> to vector<8x1xf32>
    %105 = arith.addf %102, %104 : vector<8x1xf32>
    %106 = arith.negf %105 : vector<8x1xf32>
    %107 = math.exp %106 : vector<8x1xf32>
    %cst_44 = arith.constant 1.000000e+00 : f32
    %108 = vector.broadcast %cst_44 : f32 to vector<8x1xf32>
    %109 = arith.addf %108, %107 : vector<8x1xf32>
    %110 = arith.divf %108, %109 : vector<8x1xf32>
    %c0_45 = arith.constant 0 : index
    %c0_46 = arith.constant 0 : index
    %111 = vector.load %arg8[%c0_45, %c0_46] : memref<8x1xf32, #tpu.memory_space<vmem>>, vector<8x1xf32>
    tpu.vector_store %arg8[%c0_45, %c0_46], %110 {strides = array<i32>} : memref<8x1xf32, #tpu.memory_space<vmem>>, vector<8x1xf32>,
    return
  }
  func.func @transform_0(%arg0: i32) -> (i32, i32) {
    %c0_i32 = arith.constant 0 : i32
    %c0_i32_0 = arith.constant 0 : i32
    return %arg0, %c0_i32 : i32, i32
  }
  func.func @transform_1(%arg0: i32) -> (i32, i32) {
    %c0_i32 = arith.constant 0 : i32
    %c0_i32_0 = arith.constant 0 : i32
    %c0_i32_1 = arith.constant 0 : i32
    return %c0_i32, %c0_i32_0 : i32, i32
  }
  func.func @transform_2(%arg0: i32) -> (i32, i32) {
    %c0_i32 = arith.constant 0 : i32
    %c0_i32_0 = arith.constant 0 : i32
    %c0_i32_1 = arith.constant 0 : i32
    return %c0_i32, %c0_i32_0 : i32, i32
  }
  func.func @transform_3(%arg0: i32) -> (i32, i32) {
    %c0_i32 = arith.constant 0 : i32
    %c0_i32_0 = arith.constant 0 : i32
    %c0_i32_1 = arith.constant 0 : i32
    return %c0_i32, %c0_i32_0 : i32, i32
  }
  func.func @transform_4(%arg0: i32) -> (i32, i32) {
    %c0_i32 = arith.constant 0 : i32
    %c0_i32_0 = arith.constant 0 : i32
    %c0_i32_1 = arith.constant 0 : i32
    return %c0_i32, %c0_i32_0 : i32, i32
  }
  func.func @transform_5(%arg0: i32) -> (i32, i32) {
    %c0_i32 = arith.constant 0 : i32
    %c0_i32_0 = arith.constant 0 : i32
    %c0_i32_1 = arith.constant 0 : i32
    return %c0_i32, %c0_i32_0 : i32, i32
  }
  func.func @transform_6(%arg0: i32) -> (i32, i32) {
    %c0_i32 = arith.constant 0 : i32
    %c0_i32_0 = arith.constant 0 : i32
    %c0_i32_1 = arith.constant 0 : i32
    return %c0_i32, %c0_i32_0 : i32, i32
  }
  func.func @transform_7(%arg0: i32) -> (i32, i32) {
    %c0_i32 = arith.constant 0 : i32
    %c0_i32_0 = arith.constant 0 : i32
    return %arg0, %c0_i32 : i32, i32
  }
}

</mosaic_0001>

<bundles_post_ra>
// kernel: tpu_custom_call.1
= control target key start
LH: loop header
LB: loop body
LE: loop exit
PB: predicated region body
PF: predicated region fallthrough
CT: control target
= control target key end

     0   :  { %12 = vsyncpa [#allocation3], 0  ;;  %s4973_s0 = inlined_call_operand.hbm [shape: f32[16,784], index: 0, kind: input, shape index: {}]   ;;  %s4974_s1 = inlined_call_operand.hbm [shape: bf16[784,512], index: 1, kind: input, shape index: {}]   ;;  %s4975_s2 = inlined_call_operand.hbm [shape: bf16[512,256], index: 2, kind: input, shape index: {}]   ;;  %s4976_s3 = inlined_call_operand.vmem [shape: bf16[256,128], index: 3, kind: input, shape index: {}]   ;;  %s4977_s4 = inlined_call_operand.vmem [shape: bf16[128,64], index: 4, kind: input, shape index: {}]   ;;  %s4978_s5 = inlined_call_operand.vmem [shape: bf16[64,32], index: 5, kind: input, shape index: {}]   ;;  %s4979_s6 = inlined_call_operand.hbm [shape: f32[8,512], index: 6, kind: input, shape index: {}]   ;;  %s4980_s7 = inlined_call_operand.vmem [shape: f32[16,1], index: 7, kind: output, shape index: {}]  }
   0x1   :  { %14 = vsyncpa [#allocation3 + $0x1], 0 }
   0x2   :  { %15 = vsyncpa [#allocation5], 0 }
   0x3   :  { %16 = vsyncpa [#allocation8], 0  ;;  %s4676_s24 = smov 0   ;;  %s4678_s25 = smov 0  }
   0x4   :  { %s4680_s26 = smov 0   ;;  %s4682_s27 = smov 0  }
   0x5 LB: > { %s216_s30 = sshll.u32 %s4974_s1, 4  ;;  %s4700_s8 = sadd.s32 4294967295, %s4627_s27   ;;  %s4627_s27 = sphi %s4682_s27, %s4988_s27   ;;  %s4623_s26 = sphi %s4680_s26, %s4987_s26   ;;  %s4619_s25 = sphi %s4678_s25, %s4986_s25   ;;  %s4615_s24 = sphi %s4676_s24, %s4985_s24   ;;  %s217_s30 = int_to_ptr.hbm [resolvable:$true] %s216_s30 }
   0x6   : > { %p2907_p0 = scmp.ge.s32.totalorder %s4627_s27, 1  ;;  %p43_p1 = scmp.eq.s32.totalorder %s4700_s8, 0 }
   0x7   : > { %p205_p2 = scmp.lt.s32.totalorder %s4627_s27, 3  ;;  %s4629_s10 = smov [#allocation4]  }
   0x8   : > { %s218_s11 = sshll.u32 %s4629_s10, 4  ;;  %s230_s14 = sshll.u32 %s4975_s2, 4  ;;  %s219_s11 = int_to_ptr.vmem [resolvable:$true] %s218_s11  ;;  %s231_s14 = int_to_ptr.hbm [resolvable:$true] %s230_s14 }
   0x9   : > { %p4705_p3 = pnand %p2907_p0, %p205_p2  ;;  %s4630_s16 = smov [#allocation6]  }
   0xa   : > { %s232_s17 = sshll.u32 %s4630_s16, 4  ;;  %s4631_s18 = smov 256   ;;  %s233_s17 = int_to_ptr.vmem [resolvable:$true] %s232_s17 }
   0xb   : > { %p4383_p4 = pneg %p4705_p3  ;;  %s4632_s19 = smov 16  }
   0xc   : > { %s4633_s20 = smov 128   ;;  %s4634_s21 = smov 8  }
   0xd   : > { %p4716_p5 = pnand %p4383_p4, %p43_p1  ;;  %s254_s28 = sshll.u32 %s4979_s6, 4  ;;  %s255_s28 = int_to_ptr.hbm [resolvable:$true] %s254_s28 }
   0xe   : > { %s4635_s29 = smov [#allocation7]   ;;  %s29_s12 = sadd.s32 1, %s4623_s26 }
   0xf   : > { %4386 = dma.hbm_to_vmem [thread:$0]  (!%p4716_p5), %s217_s30, 25088, %s219_s11, [#allocation5], %s4631_s18, %s4631_s18, %s4632_s19  }
  0x10   : > { %4389 = dma.hbm_to_vmem [thread:$0]  (!%p4716_p5), %s231_s14, 8192, %s233_s17, [#allocation5], %s4633_s20, %s4633_s20, %s4634_s21  }
  0x11   : > { %s256_s10 = sshll.u32 %s4635_s29, 4  ;;  %s4730_s30 = sadd.s32 1, %s4627_s27   ;;  %s257_s10 = int_to_ptr.vmem [resolvable:$true] %s256_s10 }
  0x12   : > { %4392 = dma.hbm_to_vmem [thread:$0]  (!%p4716_p5), %s255_s28, 512, %s257_s10, [#allocation8]  }
  0x13   : > { %s26_s11 = ssub.s32 %s4627_s27, %s4730_s30  ;;  %p36_p7 = scmp.ne.s32.totalorder %s4623_s26, %s4619_s25 }
  0x14   : > { %p27_p6 = scmp.eq.s32.totalorder %s26_s11, 0  ;;  %p37_p8 = scmp.eq.s32.totalorder %s4627_s27, 0 }
  0x15   : > { %p42_p9 = scmp.ne.s32.totalorder %s4619_s25, %s4615_s24  ;;  %p4400_p12 = scmp.lt.s32.totalorder %s4627_s27, 2 }
  0x16   : > { %s4741_s13 = scalar_select %p27_p6, %s4623_s26, %s29_s12  }
  0x17   : > { %p38_p10 = por %p37_p8, %p36_p7  ;;  %p4745_p11 = por %p43_p1, %p42_p9 }
  0x18   : > { %s267_s15 = sand.u32 1, %s4623_s26   ;;  %s4367_s17 = smul.u32 56, %s4627_s27 }
  0x19   : > { %s4366_s16 = smul.u32 56, %s267_s15  ;;  %p4752_p13 = pnand %p4400_p12, %p38_p10 }
  0x1a   : > { %s276_s24 = scalar_lea.hbm %s4973_s0, %s4367_s17  ;;  %s268_s28 = scalar_lea.sflag [#allocation3], %s267_s15 }
  0x1b   : > { %s271_s21 = scalar_lea.vmem [#allocation2], %s4366_s16  ;;  %s278_s23 = sshll.u32 %s276_s24, 4  ;;  %s279_s23 = int_to_ptr.hbm [resolvable:$true] %s278_s23 }
  0x1c   : > { %s280_s22 = sshll.u32 %s271_s21, 4  ;;  %s4555_s29 = sshra.s32 %s279_s23, 4  ;;  %s281_s22 = int_to_ptr.vmem [resolvable:$true] %s280_s22  ;;  %s4556_s29 = int_to_ptr.hbm [resolvable:$true] %s4555_s29 }
  0x1d   : > { %s4557_s10 = scalar_lea.hbm %s4556_s29, 56  ;;  %p4559_p2 = pneg %p4752_p13 }
  0x1e   : > { %p4558_p0 = scmp.ne.s32.totalorder %s4556_s29, %s4557_s10  ;;  %s4562_s12 = scalar_lea.hbm %s4973_s0, 112 }
  0x1f   : > { %p4563_p6 = scmp.lt.s32.totalorder %s4556_s29, %s4973_s0  ;;  %p4564_p7 = scmp.lt.s32.totalorder %s4562_s12, %s4557_s10 }
  0x20   : > { %p4560_p4 = pnand %p4559_p2, %p4558_p0 }
  0x21   : > { %p4565_p8 = por %p4564_p7, %p4563_p6 }
  0x22   : > { %p4561_p5 = pneg %p4560_p4 }
  0x24   : > { %p4566_p9 = pnand %p4565_p8, %p4561_p5 }
  0x26   : > { %4569 = shalt.err (!%p4566_p9)
}
  0x27   : > { %4396 = dma.hbm_to_vmem [thread:$0]  (!%p4752_p13), %s279_s23, 896, %s281_s22, %s268_s28  }
  0x28   : > { %289 = sbr.rel (%p4705_p3) target bundleno = 1192 (0x4a8), region = 48  ;;  %s291_s15 = sand.u32 (!%p4705_p3), 1, %s4619_s25  }
  0x29   : > { %s4368_s16 = smul.u32 (!%p4705_p3), 56, %s291_s15  ;;  %s292_s20 = scalar_lea.sflag (!%p4705_p3), [#allocation3], %s291_s15 }
  0x2b   : > { %s4772_s24 = scalar_lea.vmem (!%p4705_p3), [#allocation2], %s4368_s16 }
  0x2d   : > { %4602 = dma.done.wait (%p4745_p11), %s292_s20, 896  }
  0x2e   : > { %4604 = vsyncadd (%p4745_p11), %s292_s20, 4294966400 }
  0x2f   : > { %4606 = dma.done.wait (%p43_p1), [#allocation5], 33280  }
  0x30   : > { %4608 = vsyncadd (%p43_p1), [#allocation5], 4294934016 }
  0x31   : > { %4610 = dma.done.wait (%p43_p1), [#allocation8], 512  }
  0x32   : > { %4612 = vsyncadd (%p43_p1), [#allocation8], 4294966784  ;;  %v3032_v0 = vld [vmem:[#allocation4 + $0xe0] sm:$0xf]  ;;  %v4108_v1 = vld [vmem:[#allocation4 + $0xec] sm:$0xf0] }
  0x33   : > { %v3160_v2 = vld [vmem:[#allocation4 + $0x1e0] sm:$0xf]  ;;  %v3033_v3 = vor.u32 %v4108_v1, %v3032_v0  ;;  %v4140_v4 = vld [vmem:[#allocation4 + $0x1ec] sm:$0xf0]  ;;  %vm1546_vm0 = vcmask 130048   ;;  %vm2755_vm1 = vcmask 523264  }
  0x34   : > { %v3288_v5 = vld [vmem:[#allocation4 + $0x2e0] sm:$0xf]  ;;  %v4172_v6 = vld [vmem:[#allocation4 + $0x2ec] sm:$0xf0]  ;;  %v3161_v7 = vor.u32 %v4140_v4, %v3160_v2  ;;  %vm2785_vm2 = vcmask 261120   ;;  %p341_p1 = scmp.lt.s32.totalorder %s4700_s8, 1 }
  0x35   : > { %v3289_v8 = vor.u32 %v4172_v6, %v3288_v5  ;;  %v3416_v9 = vld [vmem:[#allocation4 + $0x3e0] sm:$0xf]  ;;  %v4204_v10 = vld [vmem:[#allocation4 + $0x3ec] sm:$0xf0]  ;;  %1550 = vmatpush.bf16.msra.mxu0 %v3033_v3  ;;  %vm2810_vm6 = vcmask 7168  }
  0x36   : > { %v3016_v11 = vld [vmem:[#allocation4 + $0xc0] sm:$0xf]  ;;  %v3417_v12 = vor.u32 %v4204_v10, %v3416_v9  ;;  %v4104_v13 = vld [vmem:[#allocation4 + $0xcc] sm:$0xf0]  ;;  %1563 = vmatpush.bf16.msra.mxu1 %v3161_v7  ;;  %s4990_s8 = smov (!%p341_p1, %s4700_s8), 1 }
  0x37   : > { %v3144_v14 = vld [vmem:[#allocation4 + $0x1c0] sm:$0xf]  ;;  %v4136_v15 = vld [vmem:[#allocation4 + $0x1cc] sm:$0xf0]  ;;  %1576 = vmatpush.bf16.msra.mxu2 %v3289_v8  ;;  %v3017_v16 = vor.u32 %v4104_v13, %v3016_v11  ;;  %s2917_s18 = sshll.u32 %s4990_s8, 3 }
  0x38   : > { %v3145_v17 = vor.u32 %v4136_v15, %v3144_v14  ;;  %v3272_v18 = vld [vmem:[#allocation4 + $0x2c0] sm:$0xf]  ;;  %v4168_v19 = vld [vmem:[#allocation4 + $0x2cc] sm:$0xf0]  ;;  %1589 = vmatpush.bf16.msra.mxu3 %v3417_v12  ;;  %s344_s23 = scalar_lea.vmem %s4980_s7, %s2917_s18 }
  0x39   : > { %v3400_v20 = vld [vmem:[#allocation4 + $0x3c0] sm:$0xf]  ;;  %v3273_v21 = vor.u32 %v4168_v19, %v3272_v18  ;;  %v4200_v22 = vld [vmem:[#allocation4 + $0x3cc] sm:$0xf0]  ;;  %1551 = vmatpush.bf16.msra.mxu0 %v3017_v16 }
  0x3a   : > { %v3000_v23 = vld [vmem:[#allocation4 + $0xa0] sm:$0xf]  ;;  %v4100_v24 = vld [vmem:[#allocation4 + $0xac] sm:$0xf0]  ;;  %v3401_v25 = vor.u32 %v4200_v22, %v3400_v20  ;;  %1564 = vmatpush.bf16.msra.mxu1 %v3145_v17 }
  0x3b   : > { %v3128_v26 = vld [vmem:[#allocation4 + $0x1a0] sm:$0xf]  ;;  %v4132_v27 = vld [vmem:[#allocation4 + $0x1ac] sm:$0xf0]  ;;  %v3001_v29 = vor.u32 %v4100_v24, %v3000_v23  ;;  %1577 = vmatpush.bf16.msra.mxu2 %v3273_v21 }
  0x3c   : > { %v3256_v28 = vld [vmem:[#allocation4 + $0x2a0] sm:$0xf]  ;;  %v4164_v30 = vld [vmem:[#allocation4 + $0x2ac] sm:$0xf0]  ;;  %v3129_v33 = vor.u32 %v4132_v27, %v3128_v26  ;;  %1590 = vmatpush.bf16.msra.mxu3 %v3401_v25 }
  0x3d   : > { %v3384_v31 = vld [vmem:[#allocation4 + $0x3a0] sm:$0xf]  ;;  %v4196_v32 = vld [vmem:[#allocation4 + $0x3ac] sm:$0xf0]  ;;  %v3257_v34 = vor.u32 %v4164_v30, %v3256_v28  ;;  %1552 = vmatpush.bf16.msra.mxu0 %v3001_v29 }
  0x3e   : > { %v2984_v35 = vld [vmem:[#allocation4 + $0x80] sm:$0xf]  ;;  %v4096_v36 = vld [vmem:[#allocation4 + $0x8c] sm:$0xf0]  ;;  %v3385_v38 = vor.u32 %v4196_v32, %v3384_v31  ;;  %1565 = vmatpush.bf16.msra.mxu1 %v3129_v33  ;;  %v4106_v33 = vld [vmem:[#allocation4 + $0xe4] sm:$0xf] }
  0x3f   : > { %v3112_v37 = vld [vmem:[#allocation4 + $0x180] sm:$0xf]  ;;  %v4128_v39 = vld [vmem:[#allocation4 + $0x18c] sm:$0xf0]  ;;  %v2985_v44 = vor.u32 %v4096_v36, %v2984_v35  ;;  %1578 = vmatpush.bf16.msra.mxu2 %v3257_v34  ;;  %v3034_v34 = vld [vmem:[#allocation4 + $0xf0] sm:$0xf0] }
  0x40   : > { %v3240_v40 = vld [vmem:[#allocation4 + $0x280] sm:$0xf]  ;;  %v4160_v41 = vld [vmem:[#allocation4 + $0x28c] sm:$0xf0]  ;;  %v3113_v45 = vor.u32 %v4128_v39, %v3112_v37  ;;  %1591 = vmatpush.bf16.msra.mxu3 %v3385_v38 }
  0x41   : > { %v3368_v42 = vld [vmem:[#allocation4 + $0x380] sm:$0xf]  ;;  %v4192_v43 = vld [vmem:[#allocation4 + $0x38c] sm:$0xf0]  ;;  %v3241_v46 = vor.u32 %v4160_v41, %v3240_v40  ;;  %1553 = vmatpush.bf16.msra.mxu0 %v2985_v44  ;;  %v3162_v44 = vld [vmem:[#allocation4 + $0x1f0] sm:$0xf0] }
  0x42   : > { %v2968_v47 = vld [vmem:[#allocation4 + $0x60] sm:$0xf]  ;;  %v4092_v48 = vld [vmem:[#allocation4 + $0x6c] sm:$0xf0]  ;;  %v3369_v50 = vor.u32 %v4192_v43, %v3368_v42  ;;  %1566 = vmatpush.bf16.msra.mxu1 %v3113_v45  ;;  %v4138_v43 = vld [vmem:[#allocation4 + $0x1e4] sm:$0xf] }
  0x43   : > { %v3096_v49 = vld [vmem:[#allocation4 + $0x160] sm:$0xf]  ;;  %v4124_v51 = vld [vmem:[#allocation4 + $0x16c] sm:$0xf0]  ;;  %v2969_v56 = vor.u32 %v4092_v48, %v2968_v47  ;;  %1579 = vmatpush.bf16.msra.mxu2 %v3241_v46  ;;  %v3037_v47 = vor.u32 %v4106_v33, %v3034_v34 }
  0x44   : > { %v3224_v52 = vld [vmem:[#allocation4 + $0x260] sm:$0xf]  ;;  %v4156_v53 = vld [vmem:[#allocation4 + $0x26c] sm:$0xf0]  ;;  %v3097_v57 = vor.u32 %v4124_v51, %v3096_v49  ;;  %1592 = vmatpush.bf16.msra.mxu3 %v3369_v50 }
  0x45   : > { %v3352_v54 = vld [vmem:[#allocation4 + $0x360] sm:$0xf]  ;;  %v4188_v55 = vld [vmem:[#allocation4 + $0x36c] sm:$0xf0]  ;;  %v3225_v58 = vor.u32 %v4156_v53, %v3224_v52  ;;  %1554 = vmatpush.bf16.msra.mxu0 %v2969_v56  ;;  %v4102_v53 = vld [vmem:[#allocation4 + $0xc4] sm:$0xf] }
  0x46   : > { %v2952_v59 = vld [vmem:[#allocation4 + $0x40] sm:$0xf]  ;;  %v4088_v60 = vld [vmem:[#allocation4 + $0x4c] sm:$0xf0]  ;;  %v3353_v62 = vor.u32 %v4188_v55, %v3352_v54  ;;  %1567 = vmatpush.bf16.msra.mxu1 %v3097_v57  ;;  %v3018_v54 = vld [vmem:[#allocation4 + $0xd0] sm:$0xf0] }
  0x47   : > { %v3080_v61 = vld [vmem:[#allocation4 + $0x140] sm:$0xf]  ;;  %v4120_v63 = vld [vmem:[#allocation4 + $0x14c] sm:$0xf0]  ;;  %v2953_v4 = vor.u32 %v4088_v60, %v2952_v59  ;;  %1580 = vmatpush.bf16.msra.mxu2 %v3225_v58  ;;  %v3165_v59 = vor.u32 %v4138_v43, %v3162_v44  ;;  %v4086_v43 = vld [vmem:[#allocation4 + $0x44] sm:$0xf] }
  0x48   : > { %v3208_v0 = vld [vmem:[#allocation4 + $0x240] sm:$0xf]  ;;  %v4152_v1 = vld [vmem:[#allocation4 + $0x24c] sm:$0xf0]  ;;  %v3081_v5 = vor.u32 %v4120_v63, %v3080_v61  ;;  %1593 = vmatpush.bf16.msra.mxu3 %v3353_v62  ;;  %v4134_v61 = vld [vmem:[#allocation4 + $0x1c4] sm:$0xf] }
  0x49   : > { %v3336_v2 = vld [vmem:[#allocation4 + $0x340] sm:$0xf]  ;;  %v4184_v3 = vld [vmem:[#allocation4 + $0x34c] sm:$0xf0]  ;;  %v3209_v6 = vor.u32 %v4152_v1, %v3208_v0  ;;  %1555 = vmatpush.bf16.msra.mxu0 %v2953_v4  ;;  %v3146_v62 = vld [vmem:[#allocation4 + $0x1d0] sm:$0xf0]  ;;  %v3021_v0 = vor.u32 %v4102_v53, %v3018_v54 }
  0x4a   : > { %v2936_v7 = vld [vmem:[#allocation4 + $0x20] sm:$0xf]  ;;  %v4084_v8 = vld [vmem:[#allocation4 + $0x2c] sm:$0xf0]  ;;  %v3337_v10 = vor.u32 %v4184_v3, %v3336_v2  ;;  %1568 = vmatpush.bf16.msra.mxu1 %v3081_v5  ;;  %v4098_v5 = vld [vmem:[#allocation4 + $0xa4] sm:$0xf] }
  0x4b   : > { %v3064_v9 = vld [vmem:[#allocation4 + $0x120] sm:$0xf]  ;;  %v4116_v11 = vld [vmem:[#allocation4 + $0x12c] sm:$0xf0]  ;;  %v2937_v16 = vor.u32 %v4084_v8, %v2936_v7  ;;  %1581 = vmatpush.bf16.msra.mxu2 %v3209_v6  ;;  %v3002_v6 = vld [vmem:[#allocation4 + $0xb0] sm:$0xf0]  ;;  %v3149_v8 = vor.u32 %v4134_v61, %v3146_v62 }
  0x4c   : > { %v3192_v12 = vld [vmem:[#allocation4 + $0x220] sm:$0xf]  ;;  %v4148_v13 = vld [vmem:[#allocation4 + $0x22c] sm:$0xf0]  ;;  %v3065_v20 = vor.u32 %v4116_v11, %v3064_v9  ;;  %1594 = vmatpush.bf16.msra.mxu3 %v3337_v10  ;;  %v4130_v10 = vld [vmem:[#allocation4 + $0x1a4] sm:$0xf] }
  0x4d   : > { %v3320_v14 = vld [vmem:[#allocation4 + $0x320] sm:$0xf]  ;;  %v4180_v15 = vld [vmem:[#allocation4 + $0x32c] sm:$0xf0]  ;;  %v3193_v21 = vor.u32 %v4148_v13, %v3192_v12  ;;  %1556 = vmatpush.bf16.msra.mxu0 %v2937_v16  ;;  %v3130_v11 = vld [vmem:[#allocation4 + $0x1b0] sm:$0xf0]  ;;  %v3005_v13 = vor.u32 %v4098_v5, %v3002_v6 }
  0x4e   : > { %v2920_v17 = vld [vmem:[#allocation4] sm:$0xf]  ;;  %v4080_v18 = vld [vmem:[#allocation4 + $0xc] sm:$0xf0]  ;;  %v3321_v25 = vor.u32 %v4180_v15, %v3320_v14  ;;  %1569 = vmatpush.bf16.msra.mxu1 %v3065_v20  ;;  %v3133_v20 = vor.u32 %v4130_v10, %v3130_v11  ;;  %v2954_v44 = vld [vmem:[#allocation4 + $0x50] sm:$0xf0] }
  0x4f   : > { %v3048_v19 = vld [vmem:[#allocation4 + $0x100] sm:$0xf]  ;;  %v4112_v22 = vld [vmem:[#allocation4 + $0x10c] sm:$0xf0]  ;;  %v2921_v32 = vor.u32 %v4080_v18, %v2920_v17  ;;  %1582 = vmatpush.bf16.msra.mxu2 %v3193_v21  ;;  %v4094_v18 = vld [vmem:[#allocation4 + $0x84] sm:$0xf] }
  0x50   : > { %v3176_v23 = vld [vmem:[#allocation4 + $0x200] sm:$0xf]  ;;  %v4144_v24 = vld [vmem:[#allocation4 + $0x20c] sm:$0xf0]  ;;  %v3049_v36 = vor.u32 %v4112_v22, %v3048_v19  ;;  %1595 = vmatpush.bf16.msra.mxu3 %v3321_v25  ;;  %v2986_v19 = vld [vmem:[#allocation4 + $0x90] sm:$0xf0] }
  0x51   : > { %v3304_v26 = vld [vmem:[#allocation4 + $0x300] sm:$0xf]  ;;  %v4176_v27 = vld [vmem:[#allocation4 + $0x30c] sm:$0xf0]  ;;  %v3177_v37 = vor.u32 %v4144_v24, %v3176_v23  ;;  %1557 = vmatpush.bf16.msra.mxu0 %v2921_v32  ;;  %v4126_v22 = vld [vmem:[#allocation4 + $0x184] sm:$0xf]  ;;  %v2989_v25 = vor.u32 %v4094_v18, %v2986_v19 }
  0x52   : > { %v3544_v28 = vld [vmem:[#allocation4 + $0x4e0] sm:$0xf]  ;;  %v4236_v29 = vld [vmem:[#allocation4 + $0x4ec] sm:$0xf0]  ;;  %v3305_v41 = vor.u32 %v4176_v27, %v3304_v26  ;;  %1570 = vmatpush.bf16.msra.mxu1 %v3049_v36  ;;  %v3114_v23 = vld [vmem:[#allocation4 + $0x190] sm:$0xf0] }
  0x53   : > { %v3672_v30 = vld [vmem:[#allocation4 + $0x5e0] sm:$0xf]  ;;  %v4268_v31 = vld [vmem:[#allocation4 + $0x5ec] sm:$0xf0]  ;;  %v3545_v42 = vor.u32 %v4236_v29, %v3544_v28  ;;  %1583 = vmatpush.bf16.msra.mxu2 %v3177_v37  ;;  %v3117_v33 = vor.u32 %v4126_v22, %v3114_v23  ;;  %v3098_v36 = vld [vmem:[#allocation4 + $0x170] sm:$0xf0] }
  0x54   : > { %v348_v35 = vld [vmem:[%s4772_s24 + $0x10] sm:$0xff]  ;;  %v4272_v39 = vld [vmem:[#allocation4 + $0x60c] sm:$0xf0]  ;;  %v349_v45 = vld [vmem:[%s4772_s24 + $0x18] sm:$0xff]  ;;  %v3673_v46 = vor.u32 %v4268_v31, %v3672_v30  ;;  %1596 = vmatpush.bf16.msra.mxu3 %v3305_v41 }
  0x55   : > { %v3688_v38 = vld [vmem:[#allocation4 + $0x600] sm:$0xf]  ;;  %v346_v40 = vld [vmem:[%s4772_s24] sm:$0xff]  ;;  %v4789_v51 = vpack.c.bf16 %v348_v35, %v348_v35  ;;  %v4793_v57 = vpack.c.bf16 %v349_v45, %v349_v45  ;;  %v347_v58 = vld [vmem:[%s4772_s24 + $0x8] sm:$0xff]  ;;  %1602 = vmatpush.bf16.msrb.mxu0 %v3545_v42 }
  0x56   : > { %v3528_v48 = vld [vmem:[#allocation4 + $0x4c0] sm:$0xf]  ;;  %v4232_v49 = vld [vmem:[#allocation4 + $0x4cc] sm:$0xf0]  ;;  %v4791_v55 = vpack.c.bf16 %v346_v40, %v346_v40  ;;  %v3689_v56 = vor.u32 %v4272_v39, %v3688_v38  ;;  %1615 = vmatpush.bf16.msrb.mxu1 %v3673_v46  ;;  %v4798_v7 = vpack.c.bf16 %v347_v58, %v347_v58  ;;  %v4090_v30 = vld [vmem:[#allocation4 + $0x64] sm:$0xf] }
  0x57   : > { %v3656_v50 = vld [vmem:[#allocation4 + $0x5c0] sm:$0xf]  ;;  %v4264_v52 = vld [vmem:[#allocation4 + $0x5cc] sm:$0xf0]  ;;  %v3529_v60 = vor.u32 %v4232_v49, %v3528_v48  ;;  %1584 = vmatmul.bf16.vlgmr.msra.gmra.mxu2 %v4789_v51  ;;  %1597 = vmatmul.bf16.vlgmr.msra.gmra.mxu3 %v4793_v57  ;;  %v2970_v31 = vld [vmem:[#allocation4 + $0x70] sm:$0xf0] }
  0x58   : > { %1641 = vmatpush.bf16.msrb.mxu3 %v3037_v47  ;;  %v3657_v63 = vor.u32 %v4264_v52, %v3656_v50  ;;  %v3512_v1 = vld [vmem:[#allocation4 + $0x4a0] sm:$0xf]  ;;  %v4228_v2 = vld [vmem:[#allocation4 + $0x4ac] sm:$0xf0]  ;;  %1558 = vmatmul.bf16.vlgmr.msra.gmra.mxu0 %v4791_v55  ;;  %v4122_v35 = vld [vmem:[#allocation4 + $0x164] sm:$0xf]  ;;  %v2973_v38 = vor.u32 %v4090_v30, %v2970_v31  ;;  %v2957_v52 = vor.u32 %v4086_v43, %v2954_v44 }
  0x59   : > { %v3640_v3 = vld [vmem:[#allocation4 + $0x5a0] sm:$0xf]  ;;  %v4260_v4 = vld [vmem:[#allocation4 + $0x5ac] sm:$0xf0]  ;;  %1635 = vmatpush.bf16.msrb.mxu2 %v3689_v56  ;;  %1603 = vmatpush.bf16.msrb.mxu0 %v3529_v60  ;;  %v3513_v9 = vor.u32 %v4228_v2, %v3512_v1  ;;  %v3101_v46 = vor.u32 %v4122_v35, %v3098_v36  ;;  %v4118_v48 = vld [vmem:[#allocation4 + $0x144] sm:$0xf] }
  0x5a   : > { %1616 = vmatpush.bf16.msrb.mxu1 %v3657_v63  ;;  %v3641_v12 = vor.u32 %v4260_v4, %v3640_v3  ;;  %v3496_v14 = vld [vmem:[#allocation4 + $0x480] sm:$0xf]  ;;  %v4224_v15 = vld [vmem:[#allocation4 + $0x48c] sm:$0xf0]  ;;  %v3082_v49 = vld [vmem:[#allocation4 + $0x150] sm:$0xf0] }
  0x5b   : > { %v3624_v16 = vld [vmem:[#allocation4 + $0x580] sm:$0xf]  ;;  %1571 = vmatmul.bf16.vlgmr.msra.gmra.mxu1 %v4798_v7  ;;  %v4256_v17 = vld [vmem:[#allocation4 + $0x58c] sm:$0xf0]  ;;  %v3497_v21 = vor.u32 %v4224_v15, %v3496_v14  ;;  %v2938_v60 = vld [vmem:[#allocation4 + $0x30] sm:$0xf0]  ;;  %v3085_v61 = vor.u32 %v4118_v48, %v3082_v49 }
  0x5c   : > { %1642 = vmatpush.bf16.msrb.mxu3 %v3021_v0  ;;  %v3625_v24 = vor.u32 %v4256_v17, %v3624_v16  ;;  %v3480_v26 = vld [vmem:[#allocation4 + $0x460] sm:$0xf]  ;;  %v4220_v27 = vld [vmem:[#allocation4 + $0x46c] sm:$0xf0]  ;;  %v4114_v63 = vld [vmem:[#allocation4 + $0x124] sm:$0xf] }
  0x5d   : > { %1654 = vmatpush.bf16.msra.mxu2 %v3165_v59  ;;  %1604 = vmatpush.bf16.msrb.mxu0 %v3513_v9  ;;  %v3608_v28 = vld [vmem:[#allocation4 + $0x560] sm:$0xf]  ;;  %v4252_v29 = vld [vmem:[#allocation4 + $0x56c] sm:$0xf0]  ;;  %v3481_v34 = vor.u32 %v4220_v27, %v3480_v26  ;;  %v4082_v59 = vld [vmem:[#allocation4 + $0x24] sm:$0xf] }
  0x5e   : > { %1617 = vmatpush.bf16.msrb.mxu1 %v3641_v12  ;;  %v352_v32 = vld [vmem:[%s4772_s24 + $0x30] sm:$0xff]  ;;  %v3609_v37 = vor.u32 %v4252_v29, %v3608_v28  ;;  %v4216_v40 = vld [vmem:[#allocation4 + $0x44c] sm:$0xf0]  ;;  %v3066_v0 = vld [vmem:[#allocation4 + $0x130] sm:$0xf0]  ;;  %v2941_v3 = vor.u32 %v4082_v59, %v2938_v60 }
  0x5f   : > { %v3464_v39 = vld [vmem:[#allocation4 + $0x440] sm:$0xf]  ;;  %v4248_v42 = vld [vmem:[#allocation4 + $0x54c] sm:$0xf0]  ;;  %v4803_v45 = vpack.c.bf16 %v352_v32, %v352_v32  ;;  %v2922_v9 = vld [vmem:[#allocation4 + $0x10] sm:$0xf0]  ;;  %v3069_v14 = vor.u32 %v4114_v63, %v3066_v0 }
  0x60   : > { %1643 = vmatpush.bf16.msrb.mxu3 %v3005_v13  ;;  %v3592_v41 = vld [vmem:[#allocation4 + $0x540] sm:$0xf]  ;;  %v3465_v47 = vor.u32 %v4216_v40, %v3464_v39  ;;  %v4212_v54 = vld [vmem:[#allocation4 + $0x42c] sm:$0xf0]  ;;  %v4170_v10 = vld [vmem:[#allocation4 + $0x2e4] sm:$0xf] }
  0x61   : > { %1655 = vmatpush.bf16.msra.mxu2 %v3149_v8  ;;  %1605 = vmatpush.bf16.msrb.mxu0 %v3497_v21  ;;  %v3593_v50 = vor.u32 %v4248_v42, %v3592_v41  ;;  %v3448_v53 = vld [vmem:[#allocation4 + $0x420] sm:$0xf]  ;;  %v4244_v58 = vld [vmem:[#allocation4 + $0x52c] sm:$0xf0]  ;;  %v4078_v8 = vld [vmem:[#allocation4 + $0x4] sm:$0xf] }
  0x62   : > { %1618 = vmatpush.bf16.msrb.mxu1 %v3625_v24  ;;  %v3576_v56 = vld [vmem:[#allocation4 + $0x520] sm:$0xf]  ;;  %v3449_v62 = vor.u32 %v4212_v54, %v3448_v53  ;;  %v4208_v4 = vld [vmem:[#allocation4 + $0x40c] sm:$0xf0]  ;;  %v3290_v11 = vld [vmem:[#allocation4 + $0x2f0] sm:$0xf0] }
  0x63   : > { %v3432_v1 = vld [vmem:[#allocation4 + $0x400] sm:$0xf]  ;;  %v3577_v2 = vor.u32 %v4244_v58, %v3576_v56  ;;  %v4240_v6 = vld [vmem:[#allocation4 + $0x50c] sm:$0xf0]  ;;  %v4202_v12 = vld [vmem:[#allocation4 + $0x3e4] sm:$0xf]  ;;  %v3293_v24 = vor.u32 %v4170_v10, %v3290_v11 }
  0x64   : > { %1644 = vmatpush.bf16.msrb.mxu3 %v2989_v25  ;;  %v3560_v5 = vld [vmem:[#allocation4 + $0x500] sm:$0xf]  ;;  %v3418_v13 = vld [vmem:[#allocation4 + $0x3f0] sm:$0xf0]  ;;  %v3433_v15 = vor.u32 %v4208_v4, %v3432_v1  ;;  %v4234_v16 = vld [vmem:[#allocation4 + $0x4e4] sm:$0xf] }
  0x65   : > { %1656 = vmatpush.bf16.msra.mxu2 %v3133_v20  ;;  %1606 = vmatpush.bf16.msrb.mxu0 %v3481_v34  ;;  %v3546_v17 = vld [vmem:[#allocation4 + $0x4f0] sm:$0xf0]  ;;  %v3561_v19 = vor.u32 %v4240_v6, %v3560_v5  ;;  %v2925_v20 = vor.u32 %v4078_v8, %v2922_v9  ;;  %v4110_v21 = vld [vmem:[#allocation4 + $0x104] sm:$0xf]  ;;  %v3421_v25 = vor.u32 %v4202_v12, %v3418_v13 }
  0x66   : > { %1619 = vmatpush.bf16.msrb.mxu1 %v3609_v37  ;;  %v350_v18 = vld [vmem:[%s4772_s24 + $0x20] sm:$0xff]  ;;  %v351_v23 = vld [vmem:[%s4772_s24 + $0x28] sm:$0xff]  ;;  %v4266_v26 = vld [vmem:[#allocation4 + $0x5e4] sm:$0xf]  ;;  %v3549_v29 = vor.u32 %v4234_v16, %v3546_v17 }
  0x67   : > { %3702 = vmatmul.msk.bf16.vlgmr.msrb.gmra.mxu2 %vm1546_vm0, %v4803_v45  ;;  %v3050_v22 = vld [vmem:[#allocation4 + $0x110] sm:$0xf0]  ;;  %v4166_v28 = vld [vmem:[#allocation4 + $0x2c4] sm:$0xf]  ;;  %v4809_v30 = vpack.c.bf16 %v350_v18, %v350_v18  ;;  %v4811_v35 = vpack.c.bf16 %v351_v23, %v351_v23 }
  0x68   : > { %1645 = vmatpush.bf16.msrb.mxu3 %v2973_v38  ;;  %v3674_v27 = vld [vmem:[#allocation4 + $0x5f0] sm:$0xf0]  ;;  %v4198_v32 = vld [vmem:[#allocation4 + $0x3c4] sm:$0xf]  ;;  %v3053_v34 = vor.u32 %v4110_v21, %v3050_v22 }
  0x69   : > { %1657 = vmatpush.bf16.msra.mxu2 %v3117_v33  ;;  %1607 = vmatpush.bf16.msrb.mxu0 %v3465_v47  ;;  %v3274_v31 = vld [vmem:[#allocation4 + $0x2d0] sm:$0xf0]  ;;  %v4230_v36 = vld [vmem:[#allocation4 + $0x4c4] sm:$0xf]  ;;  %v3677_v38 = vor.u32 %v4266_v26, %v3674_v27 }
  0x6a   : > { %1620 = vmatpush.bf16.msrb.mxu1 %v3593_v50  ;;  %v3402_v33 = vld [vmem:[#allocation4 + $0x3d0] sm:$0xf0]  ;;  %v3277_v39 = vor.u32 %v4166_v28, %v3274_v31  ;;  %v4262_v41 = vld [vmem:[#allocation4 + $0x5c4] sm:$0xf] }
  0x6b   : > { %v3530_v37 = vld [vmem:[#allocation4 + $0x4d0] sm:$0xf0]  ;;  %v3405_v40 = vor.u32 %v4198_v32, %v3402_v33  ;;  %v4162_v43 = vld [vmem:[#allocation4 + $0x2a4] sm:$0xf] }
  0x6c   : > { %1646 = vmatpush.bf16.msrb.mxu3 %v2957_v52  ;;  %v3658_v42 = vld [vmem:[#allocation4 + $0x5d0] sm:$0xf0]  ;;  %v3533_v44 = vor.u32 %v4230_v36, %v3530_v37  ;;  %v4194_v47 = vld [vmem:[#allocation4 + $0x3a4] sm:$0xf] }
  0x6d   : > { %1658 = vmatpush.bf16.msra.mxu2 %v3101_v46  ;;  %1608 = vmatpush.bf16.msrb.mxu0 %v3449_v62  ;;  %v3258_v46 = vld [vmem:[#allocation4 + $0x2b0] sm:$0xf0]  ;;  %v4226_v49 = vld [vmem:[#allocation4 + $0x4a4] sm:$0xf]  ;;  %v3661_v52 = vor.u32 %v4262_v41, %v3658_v42 }
  0x6e   : > { %1621 = vmatpush.bf16.msrb.mxu1 %v3577_v2  ;;  %v3386_v48 = vld [vmem:[#allocation4 + $0x3b0] sm:$0xf0]  ;;  %v3261_v53 = vor.u32 %v4162_v43, %v3258_v46  ;;  %v4258_v56 = vld [vmem:[#allocation4 + $0x5a4] sm:$0xf] }
  0x6f   : > { %v3514_v50 = vld [vmem:[#allocation4 + $0x4b0] sm:$0xf0]  ;;  %v3389_v54 = vor.u32 %v4194_v47, %v3386_v48  ;;  %v4158_v59 = vld [vmem:[#allocation4 + $0x284] sm:$0xf] }
  0x70   : > { %1647 = vmatpush.bf16.msrb.mxu3 %v2941_v3  ;;  %v3642_v58 = vld [vmem:[#allocation4 + $0x5b0] sm:$0xf0]  ;;  %v3517_v60 = vor.u32 %v4226_v49, %v3514_v50  ;;  %v4190_v62 = vld [vmem:[#allocation4 + $0x384] sm:$0xf] }
  0x71   : > { %1659 = vmatpush.bf16.msra.mxu2 %v3085_v61  ;;  %1609 = vmatpush.bf16.msrb.mxu0 %v3433_v15  ;;  %v3242_v61 = vld [vmem:[#allocation4 + $0x290] sm:$0xf0]  ;;  %v4222_v0 = vld [vmem:[#allocation4 + $0x484] sm:$0xf]  ;;  %v3645_v2 = vor.u32 %v4258_v56, %v3642_v58  ;;  %v3040_v56 = vld [vmem:[#allocation4 + $0xe8] sm:$0xf] }
  0x72   : > { %1622 = vmatpush.bf16.msrb.mxu1 %v3561_v19  ;;  %v3370_v63 = vld [vmem:[#allocation4 + $0x390] sm:$0xf0]  ;;  %v3245_v3 = vor.u32 %v4158_v59, %v3242_v61  ;;  %v4254_v5 = vld [vmem:[#allocation4 + $0x584] sm:$0xf]  ;;  %v4109_v58 = vld [vmem:[#allocation4 + $0xf4] sm:$0xf0] }
  0x73   : > { %v3498_v1 = vld [vmem:[#allocation4 + $0x490] sm:$0xf0]  ;;  %v3373_v4 = vor.u32 %v4190_v62, %v3370_v63  ;;  %v4154_v8 = vld [vmem:[#allocation4 + $0x264] sm:$0xf]  ;;  %v3168_v59 = vld [vmem:[#allocation4 + $0x1e8] sm:$0xf] }
  0x74   : > { %1648 = vmatpush.bf16.msrb.mxu3 %v2925_v20  ;;  %1610 = vmatmul.bf16.vlgmr.msrb.gmra.mxu0 %v4809_v30  ;;  %v3626_v6 = vld [vmem:[#allocation4 + $0x590] sm:$0xf0]  ;;  %v3501_v9 = vor.u32 %v4222_v0, %v3498_v1  ;;  %v4186_v11 = vld [vmem:[#allocation4 + $0x364] sm:$0xf]  ;;  %v4141_v61 = vld [vmem:[#allocation4 + $0x1f4] sm:$0xf0] }
  0x75   : > { %1660 = vmatpush.bf16.msra.mxu2 %v3069_v14  ;;  %1667 = vmatpush.bf16.msra.mxu0 %v3293_v24  ;;  %v3226_v10 = vld [vmem:[#allocation4 + $0x270] sm:$0xf0]  ;;  %v4218_v13 = vld [vmem:[#allocation4 + $0x464] sm:$0xf]  ;;  %v3629_v15 = vor.u32 %v4254_v5, %v3626_v6  ;;  %v3041_v6 = vor.u32 %v4109_v58, %v3040_v56  ;;  %v4093_v56 = vld [vmem:[#allocation4 + $0x74] sm:$0xf0] }
  0x76   : > { %1680 = vmatpush.bf16.msra.mxu1 %v3421_v25  ;;  %v3354_v12 = vld [vmem:[#allocation4 + $0x370] sm:$0xf0]  ;;  %v3229_v16 = vor.u32 %v4154_v8, %v3226_v10  ;;  %v4250_v18 = vld [vmem:[#allocation4 + $0x564] sm:$0xf]  ;;  %v4173_v8 = vld [vmem:[#allocation4 + $0x2f4] sm:$0xf0] }
  0x77   : > { %1623 = vmatmul.bf16.vlgmr.msrb.gmra.mxu1 %v4811_v35  ;;  %1649 = vmatmul.bf16.vlgmr.msrb.gmra.mxu3 %v4791_v55  ;;  %v3482_v14 = vld [vmem:[#allocation4 + $0x470] sm:$0xf0]  ;;  %v3357_v17 = vor.u32 %v4186_v11, %v3354_v12  ;;  %v4150_v20 = vld [vmem:[#allocation4 + $0x244] sm:$0xf]  ;;  %v4205_v10 = vld [vmem:[#allocation4 + $0x3f4] sm:$0xf0]  ;;  %v3169_v11 = vor.u32 %v4141_v61, %v3168_v59 }
  0x78   : > { %1693 = vmatpush.bf16.msra.mxu3 %v3549_v29  ;;  %v3610_v19 = vld [vmem:[#allocation4 + $0x570] sm:$0xf0]  ;;  %v3485_v21 = vor.u32 %v4218_v13, %v3482_v14  ;;  %v4182_v23 = vld [vmem:[#allocation4 + $0x344] sm:$0xf]  ;;  %v3024_v13 = vld [vmem:[#allocation4 + $0xc8] sm:$0xf] }
  0x79   : > { %1661 = vmatpush.bf16.msra.mxu2 %v3053_v34  ;;  %1668 = vmatpush.bf16.msra.mxu0 %v3277_v39  ;;  %v3210_v22 = vld [vmem:[#allocation4 + $0x250] sm:$0xf0]  ;;  %v4214_v25 = vld [vmem:[#allocation4 + $0x444] sm:$0xf]  ;;  %v3613_v27 = vor.u32 %v4250_v18, %v3610_v19  ;;  %v4105_v14 = vld [vmem:[#allocation4 + $0xd4] sm:$0xf0] }
  0x7a   : > { %1681 = vmatpush.bf16.msra.mxu1 %v3405_v40  ;;  %v3338_v24 = vld [vmem:[#allocation4 + $0x350] sm:$0xf0]  ;;  %v3213_v28 = vor.u32 %v4150_v20, %v3210_v22  ;;  %v4246_v31 = vld [vmem:[#allocation4 + $0x544] sm:$0xf]  ;;  %v3280_v20 = vld [vmem:[#allocation4 + $0x2c8] sm:$0xf] }
  0x7b   : > { %v3466_v26 = vld [vmem:[#allocation4 + $0x450] sm:$0xf0]  ;;  %v3341_v29 = vor.u32 %v4182_v23, %v3338_v24  ;;  %v4146_v33 = vld [vmem:[#allocation4 + $0x224] sm:$0xf]  ;;  %v4169_v22 = vld [vmem:[#allocation4 + $0x2d4] sm:$0xf0] }
  0x7c   : > { %1694 = vmatpush.bf16.msra.mxu3 %v3533_v44  ;;  %1662 = vmatmul.bf16.vlgmr.msra.gmra.mxu2 %v4798_v7  ;;  %v3594_v32 = vld [vmem:[#allocation4 + $0x550] sm:$0xf0]  ;;  %v3469_v34 = vor.u32 %v4214_v25, %v3466_v26  ;;  %v4178_v37 = vld [vmem:[#allocation4 + $0x324] sm:$0xf]  ;;  %v3408_v23 = vld [vmem:[#allocation4 + $0x3c8] sm:$0xf] }
  0x7d   : > { %1706 = vmatpush.bf16.msrb.mxu2 %v3677_v38  ;;  %1669 = vmatpush.bf16.msra.mxu0 %v3261_v53  ;;  %v3194_v36 = vld [vmem:[#allocation4 + $0x230] sm:$0xf0]  ;;  %v4210_v39 = vld [vmem:[#allocation4 + $0x424] sm:$0xf]  ;;  %v3597_v41 = vor.u32 %v4246_v31, %v3594_v32  ;;  %v4201_v24 = vld [vmem:[#allocation4 + $0x3d4] sm:$0xf0]  ;;  %v3281_v31 = vor.u32 %v4169_v22, %v3280_v20 }
  0x7e   : > { %1682 = vmatpush.bf16.msra.mxu1 %v3389_v54  ;;  %v3322_v38 = vld [vmem:[#allocation4 + $0x330] sm:$0xf0]  ;;  %v4242_v42 = vld [vmem:[#allocation4 + $0x524] sm:$0xf]  ;;  %v3197_v44 = vor.u32 %v4146_v33, %v3194_v36  ;;  %v3008_v26 = vld [vmem:[#allocation4 + $0xa8] sm:$0xf]  ;;  %v3409_v32 = vor.u32 %v4201_v24, %v3408_v23 }
  0x7f   : > { %v3450_v40 = vld [vmem:[#allocation4 + $0x430] sm:$0xf0]  ;;  %v3325_v46 = vor.u32 %v4178_v37, %v3322_v38  ;;  %v4142_v47 = vld [vmem:[#allocation4 + $0x204] sm:$0xf]  ;;  %v3264_v33 = vld [vmem:[#allocation4 + $0x2a8] sm:$0xf] }
  0x80   : > { %1695 = vmatpush.bf16.msra.mxu3 %v3517_v60  ;;  %v3578_v43 = vld [vmem:[#allocation4 + $0x530] sm:$0xf0]  ;;  %v4174_v49 = vld [vmem:[#allocation4 + $0x304] sm:$0xf]  ;;  %v3453_v50 = vor.u32 %v4210_v39, %v3450_v40  ;;  %v4165_v36 = vld [vmem:[#allocation4 + $0x2b4] sm:$0xf0] }
  0x81   : > { %1707 = vmatpush.bf16.msrb.mxu2 %v3661_v52  ;;  %1670 = vmatpush.bf16.msra.mxu0 %v3245_v3  ;;  %v3178_v48 = vld [vmem:[#allocation4 + $0x210] sm:$0xf0]  ;;  %v4206_v53 = vld [vmem:[#allocation4 + $0x404] sm:$0xf]  ;;  %v3581_v60 = vor.u32 %v4242_v42, %v3578_v43  ;;  %v3392_v37 = vld [vmem:[#allocation4 + $0x3a8] sm:$0xf] }
  0x82   : > { %1683 = vmatpush.bf16.msra.mxu1 %v3373_v4  ;;  %v3306_v52 = vld [vmem:[#allocation4 + $0x310] sm:$0xf0]  ;;  %v4270_v62 = vld [vmem:[#allocation4 + $0x604] sm:$0xf]  ;;  %v3181_v0 = vor.u32 %v4142_v47, %v3178_v48  ;;  %v3296_v4 = vld [vmem:[#allocation4 + $0x2e8] sm:$0xf] }
  0x83   : > { %v3434_v54 = vld [vmem:[#allocation4 + $0x410] sm:$0xf0]  ;;  %v3309_v1 = vor.u32 %v4174_v49, %v3306_v52  ;;  %v3297_v18 = vor.u32 %v4173_v8, %v3296_v4  ;;  %v4197_v38 = vld [vmem:[#allocation4 + $0x3b4] sm:$0xf0]  ;;  %v2992_v40 = vld [vmem:[#allocation4 + $0x88] sm:$0xf] }
  0x84   : > { %1696 = vmatpush.bf16.msra.mxu3 %v3501_v9  ;;  %v3690_v63 = vld [vmem:[#allocation4 + $0x610] sm:$0xf0]  ;;  %v3437_v5 = vor.u32 %v4206_v53, %v3434_v54  ;;  %v3424_v9 = vld [vmem:[#allocation4 + $0x3e8] sm:$0xf]  ;;  %v4129_v43 = vld [vmem:[#allocation4 + $0x194] sm:$0xf0] }
  0x85   : > { %1708 = vmatpush.bf16.msrb.mxu2 %v3645_v2  ;;  %1671 = vmatpush.bf16.msra.mxu0 %v3229_v16  ;;  %v4238_v2 = vld [vmem:[#allocation4 + $0x504] sm:$0xf]  ;;  %v3562_v3 = vld [vmem:[#allocation4 + $0x510] sm:$0xf0]  ;;  %v3693_v12 = vor.u32 %v4270_v62, %v3690_v63  ;;  %v3152_v16 = vld [vmem:[#allocation4 + $0x1c8] sm:$0xf]  ;;  %v3425_v19 = vor.u32 %v4205_v10, %v3424_v9 }
  0x86   : > { %1684 = vmatpush.bf16.msra.mxu1 %v3357_v17  ;;  %v4137_v17 = vld [vmem:[#allocation4 + $0x1d4] sm:$0xf0]  ;;  %v3120_v42 = vld [vmem:[#allocation4 + $0x188] sm:$0xf] }
  0x87   : > { %v3153_v25 = vor.u32 %v4137_v17, %v3152_v16  ;;  %v3248_v47 = vld [vmem:[#allocation4 + $0x288] sm:$0xf]  ;;  %v4161_v49 = vld [vmem:[#allocation4 + $0x294] sm:$0xf0]  ;;  %v3121_v53 = vor.u32 %v4129_v43, %v3120_v42 }
  0x88   : > { %1697 = vmatpush.bf16.msra.mxu3 %v3485_v21  ;;  %v3025_v21 = vor.u32 %v4105_v14, %v3024_v13  ;;  %v4193_v52 = vld [vmem:[#allocation4 + $0x394] sm:$0xf0]  ;;  %v2976_v54 = vld [vmem:[#allocation4 + $0x68] sm:$0xf] }
  0x89   : > { %1709 = vmatpush.bf16.msrb.mxu2 %v3629_v15  ;;  %1672 = vmatpush.bf16.msra.mxu0 %v3213_v28  ;;  %v3565_v15 = vor.u32 %v4238_v2, %v3562_v3  ;;  %v3136_v28 = vld [vmem:[#allocation4 + $0x1a8] sm:$0xf]  ;;  %v4125_v59 = vld [vmem:[#allocation4 + $0x174] sm:$0xf0]  ;;  %v2977_v63 = vor.u32 %v4093_v56, %v2976_v54 }
  0x8a   : > { %1685 = vmatpush.bf16.msra.mxu1 %v3341_v29  ;;  %v4133_v29 = vld [vmem:[#allocation4 + $0x1b4] sm:$0xf0]  ;;  %v3104_v58 = vld [vmem:[#allocation4 + $0x168] sm:$0xf] }
  0x8b   : > { %v3137_v39 = vor.u32 %v4133_v29, %v3136_v28  ;;  %v3232_v62 = vld [vmem:[#allocation4 + $0x268] sm:$0xf]  ;;  %v4189_v2 = vld [vmem:[#allocation4 + $0x374] sm:$0xf0]  ;;  %v3105_v3 = vor.u32 %v4125_v59, %v3104_v58 }
  0x8c   : > { %1698 = vmatpush.bf16.msra.mxu3 %v3469_v34  ;;  %v2960_v4 = vld [vmem:[#allocation4 + $0x48] sm:$0xf]  ;;  %v4121_v8 = vld [vmem:[#allocation4 + $0x154] sm:$0xf0] }
  0x8d   : > { %1710 = vmatpush.bf16.msrb.mxu2 %v3613_v27  ;;  %1673 = vmatpush.bf16.msra.mxu0 %v3197_v44  ;;  %v4101_v27 = vld [vmem:[#allocation4 + $0xb4] sm:$0xf0]  ;;  %v3265_v44 = vor.u32 %v4165_v36, %v3264_v33  ;;  %v3344_v14 = vld [vmem:[#allocation4 + $0x348] sm:$0xf] }
  0x8e   : > { %1686 = vmatpush.bf16.msra.mxu1 %v3325_v46  ;;  %v3009_v34 = vor.u32 %v4101_v27, %v3008_v26  ;;  %v3393_v46 = vor.u32 %v4197_v38, %v3392_v37  ;;  %v4153_v13 = vld [vmem:[#allocation4 + $0x254] sm:$0xf0]  ;;  %v2944_v17 = vld [vmem:[#allocation4 + $0x28] sm:$0xf] }
  0x8f   : > { %v4117_v20 = vld [vmem:[#allocation4 + $0x134] sm:$0xf0]  ;;  %v3200_v23 = vld [vmem:[#allocation4 + $0x228] sm:$0xf] }
  0x90   : > { %1699 = vmatpush.bf16.msra.mxu3 %v3453_v50  ;;  %v3376_v50 = vld [vmem:[#allocation4 + $0x388] sm:$0xf]  ;;  %v4149_v24 = vld [vmem:[#allocation4 + $0x234] sm:$0xf0] }
  0x91   : > { %1711 = vmatpush.bf16.msrb.mxu2 %v3597_v41  ;;  %1674 = vmatpush.bf16.msra.mxu0 %v3181_v0  ;;  %v4097_v41 = vld [vmem:[#allocation4 + $0x94] sm:$0xf0]  ;;  %v3377_v61 = vor.u32 %v4193_v52, %v3376_v50  ;;  %v3328_v26 = vld [vmem:[#allocation4 + $0x328] sm:$0xf]  ;;  %v3201_v38 = vor.u32 %v4149_v24, %v3200_v23  ;;  %v3042_v50 = vld [vmem:[#allocation4 + $0xf8] sm:$0xf0] }
  0x92   : > { %1687 = vmatpush.bf16.msra.mxu1 %v3309_v1  ;;  %v2993_v48 = vor.u32 %v4097_v41, %v2992_v40  ;;  %v4157_v0 = vld [vmem:[#allocation4 + $0x274] sm:$0xf0]  ;;  %v3360_v1 = vld [vmem:[#allocation4 + $0x368] sm:$0xf] }
  0x93   : > { %v3233_v9 = vor.u32 %v4157_v0, %v3232_v62  ;;  %v3361_v10 = vor.u32 %v4189_v2, %v3360_v1  ;;  %v4181_v27 = vld [vmem:[#allocation4 + $0x334] sm:$0xf0]  ;;  %v2928_v28 = vld [vmem:[#allocation4 + $0x8] sm:$0xf]  ;;  %v4139_v1 = vld [vmem:[#allocation4 + $0x1ec] sm:$0xf] }
  0x94   : > { %1700 = vmatpush.bf16.msra.mxu3 %v3437_v5  ;;  %1675 = vmatmul.bf16.vlgmr.msra.gmra.mxu0 %v4789_v51  ;;  %v4089_v5 = vld [vmem:[#allocation4 + $0x54] sm:$0xf0]  ;;  %v3680_v37 = vld [vmem:[#allocation4 + $0x5e8] sm:$0xf]  ;;  %v3170_v2 = vld [vmem:[#allocation4 + $0x1f8] sm:$0xf0] }
  0x95   : > { %1712 = vmatpush.bf16.msrb.mxu2 %v3581_v60  ;;  %1726 = vmatpush.bf16.msrb.mxu0 %v3693_v12  ;;  %v3249_v60 = vor.u32 %v4161_v49, %v3248_v47  ;;  %v2961_v12 = vor.u32 %v4089_v5, %v2960_v4  ;;  %v4113_v33 = vld [vmem:[#allocation4 + $0x114] sm:$0xf0]  ;;  %v3184_v41 = vld [vmem:[#allocation4 + $0x208] sm:$0xf]  ;;  %v4107_v47 = vld [vmem:[#allocation4 + $0xec] sm:$0xf] }
  0x96   : > { %1732 = vmatpush.bf16.msrb.mxu1 %v3041_v6  ;;  %v3088_v6 = vld [vmem:[#allocation4 + $0x148] sm:$0xf]  ;;  %v4237_v36 = vld [vmem:[#allocation4 + $0x4f4] sm:$0xf0]  ;;  %v4103_v4 = vld [vmem:[#allocation4 + $0xcc] sm:$0xf] }
  0x97   : > { %1701 = vmatmul.bf16.vlgmr.msra.gmra.mxu3 %v4809_v30  ;;  %1688 = vmatmul.bf16.vlgmr.msra.gmra.mxu1 %v4793_v57  ;;  %v3089_v16 = vor.u32 %v4121_v8, %v3088_v6  ;;  %v4269_v40 = vld [vmem:[#allocation4 + $0x5f4] sm:$0xf0]  ;;  %v3696_v52 = vld [vmem:[#allocation4 + $0x608] sm:$0xf]  ;;  %v3026_v5 = vld [vmem:[#allocation4 + $0xd8] sm:$0xf0] }
  0x98   : > { %1745 = vmatpush.bf16.msrb.mxu3 %v3169_v11  ;;  %v3216_v11 = vld [vmem:[#allocation4 + $0x248] sm:$0xf]  ;;  %v4145_v42 = vld [vmem:[#allocation4 + $0x214] sm:$0xf0]  ;;  %v3681_v54 = vor.u32 %v4269_v40, %v3680_v37  ;;  %v4127_v40 = vld [vmem:[#allocation4 + $0x18c] sm:$0xf] }
  0x99   : > { %1713 = vmatpush.bf16.msrb.mxu2 %v3565_v15  ;;  %1758 = vmatpush.bf16.msra.mxu0 %v3297_v18  ;;  %v4185_v15 = vld [vmem:[#allocation4 + $0x354] sm:$0xf0]  ;;  %v3536_v56 = vld [vmem:[#allocation4 + $0x4c8] sm:$0xf]  ;;  %v3185_v59 = vor.u32 %v4145_v42, %v3184_v41  ;;  %v3122_v41 = vld [vmem:[#allocation4 + $0x198] sm:$0xf0] }
  0x9a   : > { %1733 = vmatpush.bf16.msrb.mxu1 %v3025_v21  ;;  %v4085_v18 = vld [vmem:[#allocation4 + $0x34] sm:$0xf0]  ;;  %v3217_v21 = vor.u32 %v4153_v13, %v3216_v11  ;;  %v3345_v22 = vor.u32 %v4185_v15, %v3344_v14  ;;  %v3520_v8 = vld [vmem:[#allocation4 + $0x4a8] sm:$0xf]  ;;  %v3029_v13 = vor.u32 %v4103_v4, %v3026_v5  ;;  %v4135_v14 = vld [vmem:[#allocation4 + $0x1cc] sm:$0xf] }
  0x9b   : > { %v4233_v58 = vld [vmem:[#allocation4 + $0x4d4] sm:$0xf0]  ;;  %v3648_v11 = vld [vmem:[#allocation4 + $0x5a8] sm:$0xf]  ;;  %v3154_v15 = vld [vmem:[#allocation4 + $0x1d8] sm:$0xf0] }
  0x9c   : > { %1746 = vmatpush.bf16.msrb.mxu3 %v3153_v25  ;;  %1714 = vmatmul.bf16.vlgmr.msrb.gmra.mxu2 %v4811_v35  ;;  %v2945_v25 = vor.u32 %v4085_v18, %v2944_v17  ;;  %v4265_v62 = vld [vmem:[#allocation4 + $0x5d4] sm:$0xf0]  ;;  %v4099_v17 = vld [vmem:[#allocation4 + $0xac] sm:$0xf]  ;;  %v3010_v18 = vld [vmem:[#allocation4 + $0xb8] sm:$0xf0] }
  0x9d   : > { %1771 = vmatpush.bf16.msra.mxu2 %v3425_v19  ;;  %1759 = vmatpush.bf16.msra.mxu0 %v3281_v31  ;;  %v3072_v19 = vld [vmem:[#allocation4 + $0x128] sm:$0xf]  ;;  %v4081_v31 = vld [vmem:[#allocation4 + $0x14] sm:$0xf0]  ;;  %v4119_v4 = vld [vmem:[#allocation4 + $0x14c] sm:$0xf] }
  0x9e   : > { %1734 = vmatpush.bf16.msrb.mxu1 %v3009_v34  ;;  %v3073_v29 = vor.u32 %v4117_v20, %v3072_v19  ;;  %v3552_v34 = vld [vmem:[#allocation4 + $0x4e8] sm:$0xf]  ;;  %v2929_v43 = vor.u32 %v4081_v31, %v2928_v28  ;;  %v4257_v24 = vld [vmem:[#allocation4 + $0x594] sm:$0xf0]  ;;  %v2994_v31 = vld [vmem:[#allocation4 + $0x98] sm:$0xf0] }
  0x9f   : > { %v3553_v49 = vor.u32 %v4237_v36, %v3552_v34  ;;  %v3504_v20 = vld [vmem:[#allocation4 + $0x488] sm:$0xf]  ;;  %v4221_v34 = vld [vmem:[#allocation4 + $0x474] sm:$0xf0]  ;;  %v3090_v5 = vld [vmem:[#allocation4 + $0x158] sm:$0xf0] }
  0xa0   : > { %1747 = vmatpush.bf16.msrb.mxu3 %v3137_v39  ;;  %v3329_v39 = vor.u32 %v4181_v27, %v3328_v26  ;;  %v3632_v23 = vld [vmem:[#allocation4 + $0x588] sm:$0xf]  ;;  %v4131_v26 = vld [vmem:[#allocation4 + $0x1ac] sm:$0xf]  ;;  %v3138_v27 = vld [vmem:[#allocation4 + $0x1b8] sm:$0xf0] }
  0xa1   : > { %1772 = vmatpush.bf16.msra.mxu2 %v3409_v32  ;;  %1760 = vmatpush.bf16.msra.mxu0 %v3265_v44  ;;  %v3056_v32 = vld [vmem:[#allocation4 + $0x108] sm:$0xf]  ;;  %v3141_v36 = vor.u32 %v4131_v26, %v3138_v27 }
  0xa2   : > { %1735 = vmatpush.bf16.msrb.mxu1 %v2993_v48  ;;  %v3312_v44 = vld [vmem:[#allocation4 + $0x308] sm:$0xf]  ;;  %v3057_v48 = vor.u32 %v4113_v33, %v3056_v32  ;;  %v3633_v32 = vor.u32 %v4257_v24, %v3632_v23  ;;  %v4079_v24 = vld [vmem:[#allocation4 + $0xc] sm:$0xf] }
  0xa3   : > { %v3488_v33 = vld [vmem:[#allocation4 + $0x468] sm:$0xf] }
  0xa4   : > { %1748 = vmatpush.bf16.msrb.mxu3 %v3121_v53  ;;  %3703 = vmatmul.msk.bf16.vlgmr.msrb.gmra.mxu0 %vm1546_vm0, %v4803_v45  ;;  %v4273_v53 = vld [vmem:[#allocation4 + $0x614] sm:$0xf0]  ;;  %v3616_v37 = vld [vmem:[#allocation4 + $0x568] sm:$0xf]  ;;  %v3489_v42 = vor.u32 %v4221_v34, %v3488_v33  ;;  %v4167_v33 = vld [vmem:[#allocation4 + $0x2cc] sm:$0xf] }
  0xa5   : > { %1773 = vmatpush.bf16.msra.mxu2 %v3393_v46  ;;  %1761 = vmatpush.bf16.msra.mxu0 %v3249_v60  ;;  %v4177_v46 = vld [vmem:[#allocation4 + $0x314] sm:$0xf0]  ;;  %v3697_v0 = vor.u32 %v4273_v53, %v3696_v52  ;;  %v3282_v34 = vld [vmem:[#allocation4 + $0x2d8] sm:$0xf0] }
  0xa6   : > { %1736 = vmatpush.bf16.msrb.mxu1 %v2977_v63  ;;  %v3313_v60 = vor.u32 %v4177_v46, %v3312_v44  ;;  %v3045_v63 = vor.u32 %v4107_v47, %v3042_v50  ;;  %v2978_v44 = vld [vmem:[#allocation4 + $0x78] sm:$0xf0]  ;;  %v3472_v47 = vld [vmem:[#allocation4 + $0x448] sm:$0xf]  ;;  %v4249_v52 = vld [vmem:[#allocation4 + $0x554] sm:$0xf0] }
  0xa7   : > { %v3600_v50 = vld [vmem:[#allocation4 + $0x548] sm:$0xf] }
  0xa8   : > { %1749 = vmatpush.bf16.msrb.mxu3 %v3105_v3  ;;  %v3537_v3 = vor.u32 %v4233_v58, %v3536_v56  ;;  %v3106_v56 = vld [vmem:[#allocation4 + $0x178] sm:$0xf0] }
  0xa9   : > { %1774 = vmatpush.bf16.msra.mxu2 %v3377_v61  ;;  %1762 = vmatpush.bf16.msra.mxu0 %v3233_v9  ;;  %v3664_v61 = vld [vmem:[#allocation4 + $0x5c8] sm:$0xf]  ;;  %v4229_v9 = vld [vmem:[#allocation4 + $0x4b4] sm:$0xf0] }
  0xaa   : > { %1737 = vmatpush.bf16.msrb.mxu1 %v2961_v12  ;;  %v3665_v6 = vor.u32 %v4265_v62, %v3664_v61  ;;  %v4261_v12 = vld [vmem:[#allocation4 + $0x5b4] sm:$0xf0]  ;;  %v3601_v61 = vor.u32 %v4249_v52, %v3600_v50  ;;  %v3456_v62 = vld [vmem:[#allocation4 + $0x428] sm:$0xf]  ;;  %v4163_v50 = vld [vmem:[#allocation4 + $0x2ac] sm:$0xf] }
  0xab   : > { %v3649_v19 = vor.u32 %v4261_v12, %v3648_v11  ;;  %v4209_v12 = vld [vmem:[#allocation4 + $0x414] sm:$0xf0]  ;;  %v3266_v52 = vld [vmem:[#allocation4 + $0x2b8] sm:$0xf0] }
  0xac   : > { %1750 = vmatpush.bf16.msrb.mxu3 %v3089_v16  ;;  %v3521_v16 = vor.u32 %v4229_v9, %v3520_v8  ;;  %v4083_v8 = vld [vmem:[#allocation4 + $0x2c] sm:$0xf]  ;;  %v2946_v9 = vld [vmem:[#allocation4 + $0x38] sm:$0xf0] }
  0xad   : > { %1775 = vmatpush.bf16.msra.mxu2 %v3361_v10  ;;  %1763 = vmatpush.bf16.msra.mxu0 %v3217_v21  ;;  %v3173_v10 = vor.u32 %v4139_v1, %v3170_v2  ;;  %v4225_v21 = vld [vmem:[#allocation4 + $0x494] sm:$0xf0]  ;;  %v3584_v1 = vld [vmem:[#allocation4 + $0x528] sm:$0xf] }
  0xae   : > { %1738 = vmatpush.bf16.msrb.mxu1 %v2945_v25  ;;  %v3013_v25 = vor.u32 %v4099_v17, %v3010_v18  ;;  %v3505_v28 = vor.u32 %v4225_v21, %v3504_v20  ;;  %v4245_v2 = vld [vmem:[#allocation4 + $0x534] sm:$0xf0]  ;;  %v3298_v17 = vld [vmem:[#allocation4 + $0x2f8] sm:$0xf0]  ;;  %v4203_v18 = vld [vmem:[#allocation4 + $0x3ec] sm:$0xf] }
  0xaf   : > { %v3585_v11 = vor.u32 %v4245_v2, %v3584_v1  ;;  %v3426_v20 = vld [vmem:[#allocation4 + $0x3f8] sm:$0xf0]  ;;  %v4115_v21 = vld [vmem:[#allocation4 + $0x12c] sm:$0xf] }
  0xb0   : > { %1751 = vmatpush.bf16.msrb.mxu3 %v3073_v29  ;;  %v4095_v29 = vld [vmem:[#allocation4 + $0x8c] sm:$0xf]  ;;  %v3250_v2 = vld [vmem:[#allocation4 + $0x298] sm:$0xf0] }
  0xb1   : > { %1776 = vmatpush.bf16.msra.mxu2 %v3345_v22  ;;  %1764 = vmatpush.bf16.msra.mxu0 %v3201_v38  ;;  %v3157_v22 = vor.u32 %v4135_v14, %v3154_v15  ;;  %v4253_v38 = vld [vmem:[#allocation4 + $0x574] sm:$0xf0]  ;;  %v3093_v15 = vor.u32 %v4119_v4, %v3090_v5  ;;  %v4159_v1 = vld [vmem:[#allocation4 + $0x28c] sm:$0xf]  ;;  %v3378_v5 = vld [vmem:[#allocation4 + $0x398] sm:$0xf0] }
  0xb2   : > { %1739 = vmatpush.bf16.msrb.mxu1 %v2929_v43  ;;  %v4091_v43 = vld [vmem:[#allocation4 + $0x6c] sm:$0xf]  ;;  %v3617_v46 = vor.u32 %v4253_v38, %v3616_v37  ;;  %v4241_v14 = vld [vmem:[#allocation4 + $0x514] sm:$0xf0]  ;;  %v3410_v38 = vld [vmem:[#allocation4 + $0x3d8] sm:$0xf0] }
  0xb3   : > { %v2981_v53 = vor.u32 %v4091_v43, %v2978_v44  ;;  %v3682_v43 = vld [vmem:[#allocation4 + $0x5f8] sm:$0xf0]  ;;  %v3285_v44 = vor.u32 %v4167_v33, %v3282_v34  ;;  %v4191_v4 = vld [vmem:[#allocation4 + $0x38c] sm:$0xf] }
  0xb4   : > { %1752 = vmatpush.bf16.msrb.mxu3 %v3057_v48  ;;  %v4217_v48 = vld [vmem:[#allocation4 + $0x454] sm:$0xf0]  ;;  %v4251_v34 = vld [vmem:[#allocation4 + $0x56c] sm:$0xf] }
  0xb5   : > { %1777 = vmatpush.bf16.msra.mxu2 %v3329_v39  ;;  %1765 = vmatpush.bf16.msra.mxu0 %v3185_v59  ;;  %v2997_v39 = vor.u32 %v4095_v29, %v2994_v31  ;;  %v3473_v58 = vor.u32 %v4217_v48, %v3472_v47  ;;  %v4087_v59 = vld [vmem:[#allocation4 + $0x4c] sm:$0xf]  ;;  %v3554_v29 = vld [vmem:[#allocation4 + $0x4f8] sm:$0xf0]  ;;  %v3429_v31 = vor.u32 %v4203_v18, %v3426_v20 }
  0xb6   : > { %1784 = vmatpush.bf16.msra.mxu1 %v3553_v49  ;;  %v3125_v49 = vor.u32 %v4127_v40, %v3122_v41  ;;  %v3058_v40 = vld [vmem:[#allocation4 + $0x118] sm:$0xf0]  ;;  %v4255_v20 = vld [vmem:[#allocation4 + $0x58c] sm:$0xf] }
  0xb7   : > { %1753 = vmatmul.bf16.vlgmr.msrb.gmra.mxu3 %v4798_v7  ;;  %1740 = vmatmul.bf16.vlgmr.msrb.gmra.mxu1 %v4791_v55  ;;  %v3538_v47 = vld [vmem:[#allocation4 + $0x4d8] sm:$0xf0] }
  0xb8   : > { %1797 = vmatpush.bf16.msra.mxu3 %v3681_v54  ;;  %1766 = vmatmul.bf16.vlgmr.msra.gmra.mxu0 %v4789_v51  ;;  %v4123_v54 = vld [vmem:[#allocation4 + $0x16c] sm:$0xf]  ;;  %v3362_v18 = vld [vmem:[#allocation4 + $0x378] sm:$0xf0] }
  0xb9   : > { %1778 = vmatpush.bf16.msra.mxu2 %v3313_v60  ;;  %1817 = vmatpush.bf16.msrb.mxu0 %v3697_v0  ;;  %v2962_v60 = vld [vmem:[#allocation4 + $0x58] sm:$0xf0]  ;;  %v3109_v0 = vor.u32 %v4123_v54, %v3106_v56  ;;  %v4195_v54 = vld [vmem:[#allocation4 + $0x3ac] sm:$0xf] }
  0xba   : > { %1785 = vmatpush.bf16.msra.mxu1 %v3537_v3  ;;  %v2965_v3 = vor.u32 %v4087_v59, %v2962_v60  ;;  %v3394_v56 = vld [vmem:[#allocation4 + $0x3b8] sm:$0xf0]  ;;  %v4263_v59 = vld [vmem:[#allocation4 + $0x5cc] sm:$0xf] }
  0xbb   : > { %v3666_v60 = vld [vmem:[#allocation4 + $0x5d8] sm:$0xf0] }
  0xbc   : > { %1798 = vmatpush.bf16.msra.mxu3 %v3665_v6  ;;  %1779 = vmatmul.bf16.vlgmr.msra.gmra.mxu2 %v4793_v57 }
  0xbd   : > { %1823 = vmatpush.bf16.msrb.mxu2 %v3045_v63  ;;  %1836 = vmatpush.bf16.msra.mxu0 %v3173_v10  ;;  %v4213_v63 = vld [vmem:[#allocation4 + $0x434] sm:$0xf0]  ;;  %v3440_v10 = vld [vmem:[#allocation4 + $0x408] sm:$0xf] }
  0xbe   : > { %1786 = vmatpush.bf16.msra.mxu1 %v3521_v16  ;;  %v3457_v6 = vor.u32 %v4213_v63, %v3456_v62  ;;  %v4171_v16 = vld [vmem:[#allocation4 + $0x2ec] sm:$0xf]  ;;  %v3441_v23 = vor.u32 %v4209_v12, %v3440_v10  ;;  %v3522_v63 = vld [vmem:[#allocation4 + $0x4b8] sm:$0xf0]  ;;  %v3253_v10 = vor.u32 %v4159_v1, %v3250_v2  ;;  %v3764_v2 = vld [vmem:[#allocation6 + $0x70] sm:$0xf] }
  0xbf   : > { %v3301_v27 = vor.u32 %v4171_v16, %v3298_v17  ;;  %v4227_v62 = vld [vmem:[#allocation4 + $0x4ac] sm:$0xf]  ;;  %v3506_v12 = vld [vmem:[#allocation4 + $0x498] sm:$0xf0] }
  0xc0   : > { %1799 = vmatpush.bf16.msra.mxu3 %v3649_v19  ;;  %v2949_v19 = vor.u32 %v4083_v8, %v2946_v9  ;;  %v4259_v8 = vld [vmem:[#allocation4 + $0x5ac] sm:$0xf]  ;;  %v3650_v9 = vld [vmem:[#allocation4 + $0x5b8] sm:$0xf0] }
  0xc1   : > { %1824 = vmatpush.bf16.msrb.mxu2 %v3029_v13  ;;  %1837 = vmatpush.bf16.msra.mxu0 %v3157_v22  ;;  %v3568_v13 = vld [vmem:[#allocation4 + $0x508] sm:$0xf]  ;;  %v3074_v22 = vld [vmem:[#allocation4 + $0x138] sm:$0xf0]  ;;  %v3653_v16 = vor.u32 %v4259_v8, %v3650_v9  ;;  %v4187_v17 = vld [vmem:[#allocation4 + $0x36c] sm:$0xf] }
  0xc2   : > { %1787 = vmatpush.bf16.msra.mxu1 %v3505_v28  ;;  %v3569_v26 = vor.u32 %v4241_v14, %v3568_v13  ;;  %v4235_v28 = vld [vmem:[#allocation4 + $0x4ec] sm:$0xf]  ;;  %v3381_v13 = vor.u32 %v4191_v4, %v3378_v5  ;;  %v3698_v4 = vld [vmem:[#allocation4 + $0x618] sm:$0xf0]  ;;  %v4289_v8 = vld [vmem:[#allocation6 + $0x74] sm:$0xf0] }
  0xc3   : > { %v3557_v41 = vor.u32 %v4235_v28, %v3554_v29  ;;  %v4155_v14 = vld [vmem:[#allocation4 + $0x26c] sm:$0xf] }
  0xc4   : > { %1800 = vmatpush.bf16.msra.mxu3 %v3633_v32  ;;  %v3077_v32 = vor.u32 %v4115_v21, %v3074_v22  ;;  %v3634_v21 = vld [vmem:[#allocation4 + $0x598] sm:$0xf0]  ;;  %v4243_v9 = vld [vmem:[#allocation4 + $0x52c] sm:$0xf] }
  0xc5   : > { %1825 = vmatpush.bf16.msrb.mxu2 %v3013_v25  ;;  %1838 = vmatpush.bf16.msra.mxu0 %v3141_v36  ;;  %v2930_v25 = vld [vmem:[#allocation4 + $0x18] sm:$0xf0]  ;;  %v4199_v36 = vld [vmem:[#allocation4 + $0x3cc] sm:$0xf]  ;;  %v3637_v28 = vor.u32 %v4255_v20, %v3634_v21 }
  0xc6   : > { %1788 = vmatpush.bf16.msra.mxu1 %v3489_v42  ;;  %v2933_v37 = vor.u32 %v4079_v24, %v2930_v25  ;;  %v4267_v42 = vld [vmem:[#allocation4 + $0x5ec] sm:$0xf]  ;;  %v3413_v48 = vor.u32 %v4199_v36, %v3410_v38  ;;  %v3490_v24 = vld [vmem:[#allocation4 + $0x478] sm:$0xf0] }
  0xc7   : > { %v4151_v25 = vld [vmem:[#allocation4 + $0x24c] sm:$0xf]  ;;  %v3618_v36 = vld [vmem:[#allocation4 + $0x578] sm:$0xf0] }
  0xc8   : > { %1801 = vmatpush.bf16.msra.mxu3 %v3617_v46  ;;  %3704 = vmatmul.msk.bf16.vlgmr.msrb.gmra.mxu0 %vm1546_vm0, %v4803_v45  ;;  %v4231_v46 = vld [vmem:[#allocation4 + $0x4cc] sm:$0xf] }
  0xc9   : > { %1826 = vmatpush.bf16.msrb.mxu2 %v2997_v39  ;;  %1839 = vmatpush.bf16.msra.mxu0 %v3125_v49  ;;  %v4111_v39 = vld [vmem:[#allocation4 + $0x10c] sm:$0xf] }
  0xca   : > { %1789 = vmatpush.bf16.msra.mxu1 %v3473_v58  ;;  %v3061_v49 = vor.u32 %v4111_v39, %v3058_v40  ;;  %v3541_v58 = vor.u32 %v4231_v46, %v3538_v47  ;;  %v4215_v39 = vld [vmem:[#allocation4 + $0x44c] sm:$0xf]  ;;  %v3474_v40 = vld [vmem:[#allocation4 + $0x458] sm:$0xf0]  ;;  %v3621_v46 = vor.u32 %v4251_v34, %v3618_v36  ;;  %v4305_v34 = vld [vmem:[#allocation6 + $0xf4] sm:$0xf0] }
  0xcb   : > { %v4179_v47 = vld [vmem:[#allocation4 + $0x32c] sm:$0xf] }
  0xcc   : > { %1802 = vmatpush.bf16.msra.mxu3 %v3601_v61  ;;  %v3269_v61 = vor.u32 %v4163_v50, %v3266_v52  ;;  %v3477_v52 = vor.u32 %v4215_v39, %v3474_v40  ;;  %v3740_v39 = vld [vmem:[#allocation6 + $0x40] sm:$0xf]  ;;  %v4283_v40 = vld [vmem:[#allocation6 + $0x44] sm:$0xf0] }
  0xcd   : > { %1827 = vmatpush.bf16.msrb.mxu2 %v2981_v53  ;;  %1840 = vmatpush.bf16.msra.mxu0 %v3109_v0  ;;  %v3685_v53 = vor.u32 %v4267_v42, %v3682_v43  ;;  %v3397_v0 = vor.u32 %v4195_v54, %v3394_v56  ;;  %v4147_v43 = vld [vmem:[#allocation4 + $0x22c] sm:$0xf]  ;;  %v3602_v54 = vld [vmem:[#allocation4 + $0x558] sm:$0xf0] }
  0xce   : > { %1790 = vmatpush.bf16.msra.mxu1 %v3457_v6  ;;  %v3525_v6 = vor.u32 %v4227_v62, %v3522_v63  ;;  %v3186_v62 = vld [vmem:[#allocation4 + $0x218] sm:$0xf0]  ;;  %v4175_v63 = vld [vmem:[#allocation4 + $0x30c] sm:$0xf] }
  0xd0   : > { %1803 = vmatpush.bf16.msra.mxu3 %v3585_v11  ;;  %v4223_v11 = vld [vmem:[#allocation4 + $0x48c] sm:$0xf] }
  0xd1   : > { %1828 = vmatpush.bf16.msrb.mxu2 %v2965_v3  ;;  %1841 = vmatpush.bf16.msra.mxu0 %v3093_v15  ;;  %v3669_v3 = vor.u32 %v4263_v59, %v3666_v60  ;;  %v3234_v15 = vld [vmem:[#allocation4 + $0x278] sm:$0xf0]  ;;  %v4143_v60 = vld [vmem:[#allocation4 + $0x20c] sm:$0xf] }
  0xd2   : > { %1791 = vmatpush.bf16.msra.mxu1 %v3441_v23  ;;  %v3237_v22 = vor.u32 %v4155_v14, %v3234_v15  ;;  %v4219_v23 = vld [vmem:[#allocation4 + $0x46c] sm:$0xf]  ;;  %v3458_v59 = vld [vmem:[#allocation4 + $0x438] sm:$0xf0] }
  0xd3   : > { %v3493_v33 = vor.u32 %v4219_v23, %v3490_v24  ;;  %v3442_v14 = vld [vmem:[#allocation4 + $0x418] sm:$0xf0]  ;;  %v4287_v23 = vld [vmem:[#allocation6 + $0x64] sm:$0xf0]  ;;  %v4239_v24 = vld [vmem:[#allocation4 + $0x50c] sm:$0xf] }
  0xd4   : > { %1804 = vmatpush.bf16.msra.mxu3 %v3569_v26  ;;  %v3218_v26 = vld [vmem:[#allocation4 + $0x258] sm:$0xf0] }
  0xd5   : > { %1829 = vmatpush.bf16.msrb.mxu2 %v2949_v19  ;;  %1842 = vmatpush.bf16.msra.mxu0 %v3077_v32  ;;  %v4833_v19 = vpop.f32.mrf.mxu0  ;;  %v3346_v32 = vld [vmem:[#allocation4 + $0x358] sm:$0xf0]  ;;  %v3221_v38 = vor.u32 %v4151_v25, %v3218_v26 }
  0xd6   : > { %1849 = vmatpush.bf16.msrb.mxu1 %v3301_v27  ;;  %v4835_v27 = vld [vmem:[#allocation7] ss:$8 sm:$0xf] }
  0xd7   : > { %1792 = vmatmul.bf16.vlgmr.msra.gmra.mxu1 %v4809_v30  ;;  %1805 = vmatmul.bf16.vlgmr.msra.gmra.mxu3 %v4811_v35  ;;  %v558_v50 = vperm.slane %v4835_v27, 0 }
  0xd8   : > { %1862 = vmatpush.bf16.msrb.mxu3 %v3429_v31  ;;  %v4837_v29 = vpop.f32.mrf.mxu1  ;;  %v4183_v31 = vld [vmem:[#allocation4 + $0x34c] sm:$0xf] }
  0xd9   : > { %1830 = vmatpush.bf16.msrb.mxu2 %v2933_v37  ;;  %1843 = vmatpush.bf16.msra.mxu0 %v3061_v49 }
  0xda   : > { %1850 = vmatpush.bf16.msrb.mxu1 %v3285_v44  ;;  %v4839_v37 = vpop.f32.mrf.mxu2  ;;  %v4841_v42 = vpop.f32.mrf.mxu3  ;;  %v3202_v44 = vld [vmem:[#allocation4 + $0x238] sm:$0xf0] }
  0xdb   : > { %v3205_v56 = vor.u32 %v4147_v43, %v3202_v44 }
  0xdc   : > { %1863 = vmatpush.bf16.msrb.mxu3 %v3413_v48  ;;  %1831 = vmatmul.bf16.vlgmr.msrb.gmra.mxu2 %v4791_v55  ;;  %v3509_v55 = vor.u32 %v4223_v11, %v3506_v12  ;;  %v3330_v48 = vld [vmem:[#allocation4 + $0x338] sm:$0xf0]  ;;  %v3189_v12 = vor.u32 %v4143_v60, %v3186_v62  ;;  %v4299_v60 = vld [vmem:[#allocation6 + $0xc4] sm:$0xf0] }
  0xdd   : > { %1875 = vmatpush.bf16.msra.mxu2 %v3557_v41  ;;  %1888 = vmatpush.bf16.msrb.mxu0 %v3685_v53  ;;  %v3349_v41 = vor.u32 %v4183_v31, %v3346_v32  ;;  %v1561_v49 = vpop.f32.mrf.mxu0  ;;  %v4247_v53 = vld [vmem:[#allocation4 + $0x54c] sm:$0xf]  ;;  %v4285_v31 = vld [vmem:[#allocation6 + $0x54] sm:$0xf0] }
  0xde   : > { %1851 = vmatpush.bf16.msrb.mxu1 %v3269_v61  ;;  %1844 = vmatmul.bf16.vlgmr.msra.gmra.mxu0 %v4798_v7  ;;  %v3365_v7 = vor.u32 %v4187_v17, %v3362_v18  ;;  %v3333_v61 = vor.u32 %v4179_v47, %v3330_v48  ;;  %v3605_v1 = vor.u32 %v4247_v53, %v3602_v54  ;;  %v4281_v47 = vld [vmem:[#allocation6 + $0x34] sm:$0xf0] }
  0xdf   : > { %v1560_v18 = vadd.f32 %v4833_v19, %v558_v50  ;;  %v3812_v50 = vld [vmem:[#allocation6 + $0xd0] sm:$0xf] }
  0xe0   : > { %1864 = vmatpush.bf16.msrb.mxu3 %v3397_v0  ;;  %v3314_v0 = vld [vmem:[#allocation4 + $0x318] sm:$0xf0]  ;;  %v1574_v5 = vpop.f32.mrf.mxu1 }
  0xe1   : > { %1876 = vmatpush.bf16.msra.mxu2 %v3541_v58  ;;  %1889 = vmatpush.bf16.msrb.mxu0 %v3669_v3  ;;  %v4211_v58 = vld [vmem:[#allocation4 + $0x42c] sm:$0xf]  ;;  %v3317_v15 = vor.u32 %v4175_v63, %v3314_v0  ;;  %v1573_v25 = vadd.f32 %v4837_v29, %v1560_v18  ;;  %v3716_v0 = vld [vmem:[#allocation6 + $0x10] sm:$0xf]  ;;  %v4295_v18 = vld [vmem:[#allocation6 + $0xa4] sm:$0xf0] }
  0xe2   : > { %1852 = vmatpush.bf16.msrb.mxu1 %v3253_v10  ;;  %v4271_v3 = vld [vmem:[#allocation4 + $0x60c] sm:$0xf]  ;;  %v3586_v10 = vld [vmem:[#allocation4 + $0x538] sm:$0xf0]  ;;  %v1587_v11 = vpop.f32.mrf.mxu2  ;;  %v1600_v17 = vpop.f32.mrf.mxu3 }
  0xe3   : > { %v3589_v20 = vor.u32 %v4243_v9, %v3586_v10  ;;  %v1586_v36 = vadd.f32 %v4839_v37, %v1573_v25  ;;  %v3732_v37 = vld [vmem:[#allocation6 + $0x30] sm:$0xf]  ;;  %v4297_v9 = vld [vmem:[#allocation6 + $0xb4] sm:$0xf0]  ;;  %v3788_v17 = vld [vmem:[#allocation6 + $0xa0] sm:$0xf] }
  0xe4   : > { %1865 = vmatpush.bf16.msrb.mxu3 %v3381_v13  ;;  %v4207_v13 = vld [vmem:[#allocation4 + $0x40c] sm:$0xf]  ;;  %v3733_v54 = vor.u32 %v4281_v47, %v3732_v37 }
  0xe5   : > { %1877 = vmatpush.bf16.msra.mxu2 %v3525_v6  ;;  %1890 = vmatpush.bf16.msrb.mxu0 %v3653_v16  ;;  %v3461_v6 = vor.u32 %v4211_v58, %v3458_v59  ;;  %v3701_v16 = vor.u32 %v4271_v3, %v3698_v4  ;;  %v3445_v21 = vor.u32 %v4207_v13, %v3442_v14  ;;  %v3724_v58 = vld [vmem:[#allocation6 + $0x20] sm:$0xf]  ;;  %v4275_v14 = vld [vmem:[#allocation6 + $0x4] sm:$0xf0] }
  0xe6   : > { %1853 = vmatpush.bf16.msrb.mxu1 %v3237_v22  ;;  %v3756_v22 = vld [vmem:[#allocation6 + $0x60] sm:$0xf]  ;;  %v1599_v43 = vadd.f32 %v4841_v42, %v1586_v36  ;;  %v4279_v42 = vld [vmem:[#allocation6 + $0x24] sm:$0xf0] }
  0xe7   : > { %v3757_v26 = vor.u32 %v4287_v23, %v3756_v22  ;;  %v3725_v62 = vor.u32 %v4279_v42, %v3724_v58  ;;  %v3708_v13 = vld [vmem:[#allocation6] sm:$0xf]  ;;  %v3734_v58 = vld [vmem:[#allocation6 + $0x38] sm:$0xf0] }
  0xe8   : > { %1866 = vmatpush.bf16.msrb.mxu3 %v3365_v7  ;;  %v3570_v7 = vld [vmem:[#allocation4 + $0x518] sm:$0xf0]  ;;  %v3772_v36 = vld [vmem:[#allocation6 + $0x80] sm:$0xf] }
  0xe9   : > { %1878 = vmatpush.bf16.msra.mxu2 %v3509_v55  ;;  %1891 = vmatpush.bf16.msrb.mxu0 %v3637_v28  ;;  %v3765_v55 = vor.u32 %v4289_v8, %v3764_v2  ;;  %v3573_v19 = vor.u32 %v4239_v24, %v3570_v7  ;;  %v3748_v28 = vld [vmem:[#allocation6 + $0x50] sm:$0xf]  ;;  %v4286_v24 = vld [vmem:[#allocation6 + $0x64] sm:$0xf]  ;;  %v3758_v7 = vld [vmem:[#allocation6 + $0x68] sm:$0xf0] }
  0xea   : > { %1854 = vmatpush.bf16.msrb.mxu1 %v3221_v38  ;;  %v1637_v32 = vpop.f32.mrf.mxu2  ;;  %v3749_v29 = vor.u32 %v4285_v31, %v3748_v28  ;;  %v3796_v8 = vld [vmem:[#allocation6 + $0xb0] sm:$0xf]  ;;  %v559_v28 = vperm.slane %v4835_v27, 1 }
  0xec   : > { %1867 = vmatpush.bf16.msrb.mxu3 %v3349_v41  ;;  %v4303_v41 = vld [vmem:[#allocation6 + $0xe4] sm:$0xf0] }
  0xed   : > { %1879 = vmatpush.bf16.msra.mxu2 %v3493_v33  ;;  %1892 = vmatpush.bf16.msrb.mxu0 %v3621_v46  ;;  %v3828_v33 = vld [vmem:[#allocation6 + $0xf0] sm:$0xf] }
  0xee   : > { %1855 = vmatpush.bf16.msrb.mxu1 %v3205_v56  ;;  %v3829_v38 = vor.u32 %v4305_v34, %v3828_v33  ;;  %v4284_v33 = vld [vmem:[#allocation6 + $0x54] sm:$0xf]  ;;  %v3750_v34 = vld [vmem:[#allocation6 + $0x58] sm:$0xf0] }
  0xf0   : > { %1868 = vmatpush.bf16.msrb.mxu3 %v3333_v61 }
  0xf1   : > { %1880 = vmatpush.bf16.msra.mxu2 %v3477_v52  ;;  %1893 = vmatpush.bf16.msrb.mxu0 %v3605_v1  ;;  %v1611_v46 = vpop.f32.mrf.mxu0  ;;  %v4301_v52 = vld [vmem:[#allocation6 + $0xd4] sm:$0xf0] }
  0xf2   : > { %1856 = vmatpush.bf16.msrb.mxu1 %v3189_v12  ;;  %v1612_v48 = vadd.f32 %v1611_v46, %v1599_v43  ;;  %v1639_v49 = vpop.f32.mrf.mxu2  ;;  %v3813_v56 = vor.u32 %v4301_v52, %v3812_v50  ;;  %v4277_v1 = vld [vmem:[#allocation6 + $0x14] sm:$0xf0]  ;;  %v3797_v12 = vor.u32 %v4297_v9, %v3796_v8  ;;  %v4302_v43 = vld [vmem:[#allocation6 + $0xe4] sm:$0xf]  ;;  %v4276_v8 = vld [vmem:[#allocation6 + $0x14] sm:$0xf] }
  0xf3   : > { %v3717_v11 = vor.u32 %v4277_v1, %v3716_v0  ;;  %v3726_v0 = vld [vmem:[#allocation6 + $0x28] sm:$0xf0]  ;;  %v3718_v9 = vld [vmem:[#allocation6 + $0x18] sm:$0xf0] }
  0xf4   : > { %1869 = vmatpush.bf16.msrb.mxu3 %v3317_v15  ;;  %v4288_v15 = vld [vmem:[#allocation6 + $0x74] sm:$0xf] }
  0xf5   : > { %1881 = vmatpush.bf16.msra.mxu2 %v3461_v6  ;;  %1894 = vmatpush.bf16.msrb.mxu0 %v3589_v20 }
  0xf6   : > { %1908 = vmatpush.bf16.msra.mxu1 %v3701_v16 }
  0xf7   : > { %1857 = vmatmul.bf16.vlgmr.msrb.gmra.mxu1 %v4789_v51  ;;  %1870 = vmatmul.bf16.vlgmr.msrb.gmra.mxu3 %v4793_v57  ;;  %v3820_v51 = vld [vmem:[#allocation6 + $0xe0] sm:$0xf]  ;;  %v3741_v57 = vor.u32 %v4283_v40, %v3740_v39 }
  0xf8   : > { %2345 = vmatpush.bf16.msra.mxu3 %v3765_v55  ;;  %v3821_v44 = vor.u32 %v4303_v41, %v3820_v51  ;;  %v3709_v55 = vor.u32 %v4275_v14, %v3708_v13  ;;  %v3830_v41 = vld [vmem:[#allocation6 + $0xf8] sm:$0xf0]  ;;  %v4296_v14 = vld [vmem:[#allocation6 + $0xb4] sm:$0xf] }
  0xf9   : > { %1882 = vmatpush.bf16.msra.mxu2 %v3445_v21  ;;  %1895 = vmatpush.bf16.msrb.mxu0 %v3573_v19  ;;  %v1613_v2 = vpop.f32.mrf.mxu0  ;;  %v3789_v21 = vor.u32 %v4295_v18, %v3788_v17  ;;  %v4293_v19 = vld [vmem:[#allocation6 + $0x94] sm:$0xf0]  ;;  %v4294_v17 = vld [vmem:[#allocation6 + $0xa4] sm:$0xf]  ;;  %v3790_v18 = vld [vmem:[#allocation6 + $0xa8] sm:$0xf0] }
  0xfa   : > { %2358 = vmatpush.bf16.msrb.mxu1 %v3829_v38  ;;  %v1650_v3 = vpop.f32.mrf.mxu3  ;;  %v4304_v38 = vld [vmem:[#allocation6 + $0xf4] sm:$0xf] }
  0xfb   : > { %v1651_v40 = vadd.f32 %v1650_v3, %v559_v28  ;;  %v3833_v47 = vor.u32 %v4304_v38, %v3830_v41  ;;  %v4298_v3 = vld [vmem:[#allocation6 + $0xc4] sm:$0xf]  ;;  %v4292_v28 = vld [vmem:[#allocation6 + $0x94] sm:$0xf] }
  0xfc   : > { %2346 = vmatpush.bf16.msra.mxu3 %v3757_v26  ;;  %1883 = vmatmul.bf16.vlgmr.msra.gmra.mxu2 %v4809_v30  ;;  %v1624_v30 = vpop.f32.mrf.mxu1  ;;  %v3780_v26 = vld [vmem:[#allocation6 + $0x90] sm:$0xf]  ;;  %v4290_v41 = vld [vmem:[#allocation6 + $0x84] sm:$0xf] }
  0xfd   : > { %1896 = vmatmul.bf16.vlgmr.msrb.gmra.mxu0 %v4811_v35  ;;  %v1625_v53 = vadd.f32 %v1624_v30, %v1612_v48  ;;  %v3804_v35 = vld [vmem:[#allocation6 + $0xc0] sm:$0xf]  ;;  %v3781_v31 = vor.u32 %v4293_v19, %v3780_v26  ;;  %v4282_v48 = vld [vmem:[#allocation6 + $0x44] sm:$0xf]  ;;  %v3742_v30 = vld [vmem:[#allocation6 + $0x48] sm:$0xf0] }
  0xfe   : > { %2359 = vmatpush.bf16.msrb.mxu1 %v3821_v44  ;;  %v3805_v63 = vor.u32 %v4299_v60, %v3804_v35  ;;  %v3753_v44 = vor.u32 %v4284_v33, %v3750_v34  ;;  %v3814_v35 = vld [vmem:[#allocation6 + $0xd8] sm:$0xf0]  ;;  %v4319_v26 = vld [vmem:[#allocation6 + $0x164] sm:$0xf0]  ;;  %v3876_v34 = vld [vmem:[#allocation6 + $0x150] sm:$0xf] }
  0xff   : > { %v4852_v59 = vadd.f32 %v1637_v32, %v1625_v53  ;;  %v1663_v6 = vpop.f32.mrf.mxu2  ;;  %v3761_v32 = vor.u32 %v4286_v24, %v3758_v7  ;;  %v3793_v24 = vor.u32 %v4294_v17, %v3790_v18  ;;  %v3886_v17 = vld [vmem:[#allocation6 + $0x168] sm:$0xf0]  ;;  %v3956_v18 = vld [vmem:[#allocation6 + $0x1f0] sm:$0xf] }
 0x100   : > { %2347 = vmatpush.bf16.msra.mxu3 %v3749_v29  ;;  %v4291_v29 = vld [vmem:[#allocation6 + $0x84] sm:$0xf0]  ;;  %v1664_v52 = vadd.f32 %v1663_v6, %v1651_v40 }
 0x101   : > { %v1918_v61 = vmul.f32 0.044715, %v4852_v59  ;;  %v3773_v51 = vor.u32 %v4291_v29, %v3772_v36  ;;  %v1914_v46 = vmul.f32 0.5, %v4852_v59  ;;  %v4317_v36 = vld [vmem:[#allocation6 + $0x154] sm:$0xf0] }
 0x102   : > { %2360 = vmatpush.bf16.msrb.mxu1 %v3813_v56  ;;  %v1652_v23 = vpop.f32.mrf.mxu3  ;;  %v4280_v56 = vld [vmem:[#allocation6 + $0x34] sm:$0xf] }
 0x103   : > { %v1922_v4 = vmul.f32 %v1918_v61, %v4852_v59 }
 0x104   : > { %2348 = vmatpush.bf16.msra.mxu3 %v3741_v57  ;;  %v1626_v5 = vpop.f32.mrf.mxu1  ;;  %v3822_v57 = vld [vmem:[#allocation6 + $0xe8] sm:$0xf0] }
 0x105   : > { %v1926_v10 = vmul.f32 %v1922_v4, %v4852_v59  ;;  %v3825_v50 = vor.u32 %v4302_v43, %v3822_v57  ;;  %v3806_v4 = vld [vmem:[#allocation6 + $0xc8] sm:$0xf0]  ;;  %v3877_v57 = vor.u32 %v4317_v36, %v3876_v34  ;;  %v4314_v34 = vld [vmem:[#allocation6 + $0x144] sm:$0xf] }
 0x106   : > { %2361 = vmatpush.bf16.msrb.mxu1 %v3805_v63  ;;  %v4278_v63 = vld [vmem:[#allocation6 + $0x24] sm:$0xf]  ;;  %v3809_v6 = vor.u32 %v4298_v3, %v3806_v4  ;;  %v3774_v43 = vld [vmem:[#allocation6 + $0x88] sm:$0xf0]  ;;  %v3844_v3 = vld [vmem:[#allocation6 + $0x110] sm:$0xf] }
 0x107   : > { %3705 = vmatmul.msk.bf16.vlgmr.msra.gmra.mxu1 %vm1546_vm0, %v4803_v45  ;;  %v3766_v45 = vld [vmem:[#allocation6 + $0x78] sm:$0xf0]  ;;  %v1930_v16 = vadd.f32 %v1926_v10, %v4852_v59  ;;  %v1665_v25 = vpop.f32.mrf.mxu2  ;;  %v4300_v59 = vld [vmem:[#allocation6 + $0xd4] sm:$0xf]  ;;  %v3729_v5 = vor.u32 %v4278_v63, %v3726_v0  ;;  %v4309_v4 = vld [vmem:[#allocation6 + $0x114] sm:$0xf0] }
 0x108   : > { %2349 = vmatpush.bf16.msra.mxu3 %v3733_v54  ;;  %v3769_v22 = vor.u32 %v4288_v15, %v3766_v45  ;;  %v3745_v54 = vor.u32 %v4282_v48, %v3742_v30  ;;  %v3817_v61 = vor.u32 %v4300_v59, %v3814_v35  ;;  %v3798_v15 = vld [vmem:[#allocation6 + $0xb8] sm:$0xf0]  ;;  %v3721_v45 = vor.u32 %v4276_v8, %v3718_v9  ;;  %v3884_v25 = vld [vmem:[#allocation6 + $0x160] sm:$0xf] }
 0x109   : > { %v1934_v20 = vmul.f32 0.7978846, %v1930_v16  ;;  %v3801_v16 = vor.u32 %v4296_v14, %v3798_v15  ;;  %v3885_v33 = vor.u32 %v4319_v26, %v3884_v25  ;;  %v3836_v9 = vld [vmem:[#allocation6 + $0x100] sm:$0xf]  ;;  %v4320_v14 = vld [vmem:[#allocation6 + $0x174] sm:$0xf] }
 0x10a   : > { %2362 = vmatpush.bf16.msrb.mxu1 %v3797_v12  ;;  %v3894_v15 = vld [vmem:[#allocation6 + $0x178] sm:$0xf0] }
 0x10b   : > { %4443 = vtanh.f32 %v1934_v20  ;;  %v4274_v20 = vld [vmem:[#allocation6 + $0x4] sm:$0xf] }
 0x10c   : > { %2350 = vmatpush.bf16.msra.mxu3 %v3725_v62  ;;  %v3737_v62 = vor.u32 %v4280_v56, %v3734_v58  ;;  %v3860_v56 = vld [vmem:[#allocation6 + $0x130] sm:$0xf]  ;;  %v4313_v58 = vld [vmem:[#allocation6 + $0x134] sm:$0xf0] }
 0x10e   : > { %2363 = vmatpush.bf16.msrb.mxu1 %v3789_v21  ;;  %v3710_v21 = vld [vmem:[#allocation6 + $0x8] sm:$0xf0] }
 0x110   : > { %2351 = vmatpush.bf16.msra.mxu3 %v3717_v11 }
 0x111   : > { %v4444_v39 = vpop.eup %4443  ;;  %v1676_v42 = vpop.f32.mrf.mxu0 }
 0x112   : > { %2364 = vmatpush.bf16.msrb.mxu1 %v3781_v31  ;;  %v1942_v37 = vadd.f32 1.0, %v4444_v39  ;;  %v1677_v60 = vadd.f32 %v1676_v42, %v1664_v52  ;;  %v3782_v31 = vld [vmem:[#allocation6 + $0x98] sm:$0xf0]  ;;  %v3861_v42 = vor.u32 %v4313_v58, %v3860_v56  ;;  %v3854_v56 = vld [vmem:[#allocation6 + $0x128] sm:$0xf0] }
 0x113   : > { %v3785_v39 = vor.u32 %v4292_v28, %v3782_v31 }
 0x114   : > { %2352 = vmatpush.bf16.msra.mxu3 %v3709_v55  ;;  %v1946_v49 = vmul.f32 %v1942_v37, %v1914_v46  ;;  %v1689_v1 = vpop.f32.mrf.mxu1  ;;  %v3892_v55 = vld [vmem:[#allocation6 + $0x170] sm:$0xf]  ;;  %v3777_v46 = vor.u32 %v4290_v41, %v3774_v43  ;;  %v4333_v43 = vld [vmem:[#allocation6 + $0x1d4] sm:$0xf0] }
 0x115   : > { %v1690_v2 = vadd.f32 %v1689_v1, %v1677_v60  ;;  %v3852_v60 = vld [vmem:[#allocation6 + $0x120] sm:$0xf]  ;;  %v3940_v41 = vld [vmem:[#allocation6 + $0x1d0] sm:$0xf] }
 0x116   : > { %2365 = vmatpush.bf16.msrb.mxu1 %v3773_v51  ;;  %v4862_v53 = vpack.c.bf16 %v1946_v49, %v1946_v49  ;;  %v3868_v49 = vld [vmem:[#allocation6 + $0x140] sm:$0xf] }
 0x118   : > { %2397 = vmatpush.bf16.msrb.mxu3 %v3769_v22  ;;  %v4321_v22 = vld [vmem:[#allocation6 + $0x174] sm:$0xf0] }
 0x119   : > { %2353 = vmatmul.bf16.vlgmr.msra.gmra.mxu3 %v4862_v53  ;;  %v1678_v10 = vpop.f32.mrf.mxu0  ;;  %v3893_v7 = vor.u32 %v4321_v22, %v3892_v55  ;;  %v4337_v55 = vld [vmem:[#allocation6 + $0x1f4] sm:$0xf0]  ;;  %v560_v22 = vperm.slane %v4835_v27, 2 }
 0x11a   : > { %2410 = vmatpush.bf16.msra.mxu1 %v3833_v47  ;;  %v1702_v11 = vpop.f32.mrf.mxu3  ;;  %v4307_v10 = vld [vmem:[#allocation6 + $0x104] sm:$0xf0] }
 0x11b   : > { %v1703_v12 = vadd.f32 %v1702_v11, %v1690_v2  ;;  %2371 = vmatpush.bf16.msrb.mxu2 %v3893_v7  ;;  %v3878_v7 = vld [vmem:[#allocation6 + $0x158] sm:$0xf0] }
 0x11c   : > { %2398 = vmatpush.bf16.msrb.mxu3 %v3761_v32  ;;  %v1691_v23 = vpop.f32.mrf.mxu1  ;;  %v3713_v32 = vor.u32 %v4274_v20, %v3710_v21  ;;  %v3957_v21 = vor.u32 %v4337_v55, %v3956_v18 }
 0x11e   : > { %2411 = vmatpush.bf16.msra.mxu1 %v3825_v50  ;;  %v4315_v50 = vld [vmem:[#allocation6 + $0x144] sm:$0xf0]  ;;  %2384 = vmatpush.bf16.msra.mxu0 %v3957_v21 }
 0x11f   : > { %v1715_v13 = vpop.f32.mrf.mxu2  ;;  %2372 = vmatpush.bf16.msrb.mxu2 %v3885_v33  ;;  %v4335_v33 = vld [vmem:[#allocation6 + $0x1e4] sm:$0xf0] }
 0x120   : > { %2399 = vmatpush.bf16.msrb.mxu3 %v3753_v44  ;;  %v1716_v19 = vadd.f32 %v1715_v13, %v1703_v12  ;;  %v3837_v13 = vor.u32 %v4307_v10, %v3836_v9  ;;  %v4323_v21 = vld [vmem:[#allocation6 + $0x184] sm:$0xf0] }
 0x121   : > { %v1728_v29 = vpop.f32.mrf.mxu0 }
 0x122   : > { %2412 = vmatpush.bf16.msra.mxu1 %v3817_v61  ;;  %v1704_v38 = vpop.f32.mrf.mxu3  ;;  %v1729_v40 = vadd.f32 %v1728_v29, %v1716_v19  ;;  %v4311_v61 = vld [vmem:[#allocation6 + $0x124] sm:$0xf0] }
 0x123   : > { %2373 = vmatpush.bf16.msrb.mxu2 %v3877_v57  ;;  %v3870_v38 = vld [vmem:[#allocation6 + $0x148] sm:$0xf0]  ;;  %v4312_v57 = vld [vmem:[#allocation6 + $0x134] sm:$0xf] }
 0x124   : > { %2400 = vmatpush.bf16.msrb.mxu3 %v3745_v54  ;;  %v1919_v44 = vmul.f32 0.044715, %v1729_v40  ;;  %v3869_v54 = vor.u32 %v4315_v50, %v3868_v49  ;;  %v1915_v63 = vmul.f32 0.5, %v1729_v40  ;;  %v4310_v49 = vld [vmem:[#allocation6 + $0x124] sm:$0xf] }
 0x126   : > { %2413 = vmatpush.bf16.msra.mxu1 %v3809_v6  ;;  %v1923_v37 = vmul.f32 %v1919_v44, %v1729_v40  ;;  %v3941_v44 = vor.u32 %v4333_v43, %v3940_v41 }
 0x127   : > { %v1717_v51 = vpop.f32.mrf.mxu2  ;;  %2374 = vmatpush.bf16.msrb.mxu2 %v3869_v54 }
 0x128   : > { %2401 = vmatpush.bf16.msrb.mxu3 %v3737_v62  ;;  %v1927_v47 = vmul.f32 %v1923_v37, %v1729_v40  ;;  %v3853_v62 = vor.u32 %v4311_v61, %v3852_v60  ;;  %v3924_v60 = vld [vmem:[#allocation6 + $0x1b0] sm:$0xf]  ;;  %v4329_v61 = vld [vmem:[#allocation6 + $0x1b4] sm:$0xf0] }
 0x129   : > { %v1730_v48 = vpop.f32.mrf.mxu0 }
 0x12a   : > { %2414 = vmatpush.bf16.msra.mxu1 %v3801_v16  ;;  %v1931_v30 = vadd.f32 %v1927_v47, %v1729_v40  ;;  %v4318_v16 = vld [vmem:[#allocation6 + $0x164] sm:$0xf]  ;;  %v3932_v48 = vld [vmem:[#allocation6 + $0x1c0] sm:$0xf] }
 0x12b   : > { %2375 = vmatpush.bf16.msrb.mxu2 %v3861_v42  ;;  %v3889_v23 = vor.u32 %v4318_v16, %v3886_v17  ;;  %v3857_v42 = vor.u32 %v4310_v49, %v3854_v56  ;;  %v4328_v49 = vld [vmem:[#allocation6 + $0x1b4] sm:$0xf] }
 0x12c   : > { %2402 = vmatpush.bf16.msrb.mxu3 %v3729_v5  ;;  %v1935_v52 = vmul.f32 0.7978846, %v1931_v30  ;;  %v3845_v5 = vor.u32 %v4309_v4, %v3844_v3  ;;  %v4331_v30 = vld [vmem:[#allocation6 + $0x1c4] sm:$0xf0]  ;;  %v3916_v4 = vld [vmem:[#allocation6 + $0x1a0] sm:$0xf] }
 0x12d   : > { %v3933_v54 = vor.u32 %v4331_v30, %v3932_v48 }
 0x12e   : > { %2415 = vmatpush.bf16.msra.mxu1 %v3793_v24  ;;  %4445 = vtanh.f32 %v1935_v52  ;;  %v4316_v24 = vld [vmem:[#allocation6 + $0x154] sm:$0xf] }
 0x12f   : > { %2376 = vmatpush.bf16.msrb.mxu2 %v3853_v62  ;;  %v3881_v28 = vor.u32 %v4316_v24, %v3878_v7  ;;  %v3958_v24 = vld [vmem:[#allocation6 + $0x1f8] sm:$0xf0]  ;;  %v4334_v7 = vld [vmem:[#allocation6 + $0x1e4] sm:$0xf] }
 0x130   : > { %2403 = vmatpush.bf16.msrb.mxu3 %v3721_v45  ;;  %v3897_v45 = vor.u32 %v4320_v14, %v3894_v15  ;;  %v3908_v15 = vld [vmem:[#allocation6 + $0x190] sm:$0xf] }
 0x132   : > { %2416 = vmatpush.bf16.msra.mxu1 %v3785_v39  ;;  %v3873_v39 = vor.u32 %v4314_v34, %v3870_v38 }
 0x133   : > { %2377 = vmatpush.bf16.msrb.mxu2 %v3845_v5  ;;  %v4327_v5 = vld [vmem:[#allocation6 + $0x1a4] sm:$0xf0] }
 0x134   : > { %2404 = vmatpush.bf16.msrb.mxu3 %v3713_v32  ;;  %v1741_v35 = vpop.f32.mrf.mxu1  ;;  %v3948_v32 = vld [vmem:[#allocation6 + $0x1e0] sm:$0xf]  ;;  %v3917_v10 = vor.u32 %v4327_v5, %v3916_v4  ;;  %v3902_v4 = vld [vmem:[#allocation6 + $0x188] sm:$0xf0] }
 0x135   : > { %v1767_v59 = vpop.f32.mrf.mxu0  ;;  %v1742_v19 = vadd.f32 %v1741_v35, %v560_v22  ;;  %v3949_v29 = vor.u32 %v4335_v33, %v3948_v32  ;;  %v4336_v22 = vld [vmem:[#allocation6 + $0x1f4] sm:$0xf]  ;;  %v3942_v32 = vld [vmem:[#allocation6 + $0x1d8] sm:$0xf0] }
 0x136   : > { %2417 = vmatpush.bf16.msra.mxu1 %v3777_v46  ;;  %v3862_v46 = vld [vmem:[#allocation6 + $0x138] sm:$0xf0] }
 0x137   : > { %2405 = vmatmul.bf16.vlgmr.msrb.gmra.mxu3 %v4862_v53  ;;  %v4446_v53 = vpop.eup %4445  ;;  %2378 = vmatpush.bf16.msrb.mxu2 %v3837_v13  ;;  %v3865_v37 = vor.u32 %v4312_v57, %v3862_v46 }
 0x138   : > { %v1943_v0 = vadd.f32 1.0, %v4446_v53  ;;  %2385 = vmatpush.bf16.msra.mxu0 %v3949_v29  ;;  %v4308_v53 = vld [vmem:[#allocation6 + $0x114] sm:$0xf] }
 0x13a   : > { %v1754_v1 = vpop.f32.mrf.mxu3  ;;  %v1947_v2 = vmul.f32 %v1943_v0, %v1915_v63  ;;  %v3925_v0 = vor.u32 %v4329_v61, %v3924_v60 }
 0x13b   : > { %2423 = vmatpush.bf16.msra.mxu2 %v3897_v45  ;;  %v1755_v31 = vadd.f32 %v1754_v1, %v1742_v19  ;;  %v3846_v1 = vld [vmem:[#allocation6 + $0x118] sm:$0xf0]  ;;  %v4325_v45 = vld [vmem:[#allocation6 + $0x194] sm:$0xf0]  ;;  %v3961_v19 = vor.u32 %v4336_v22, %v3958_v24 }
 0x13c   : > { %v1951_v8 = vpack.c.bf16 %v1947_v2, %v1947_v2  ;;  %v1743_v12 = vpop.f32.mrf.mxu1  ;;  %2386 = vmatpush.bf16.msra.mxu0 %v3941_v44  ;;  %v3849_v2 = vor.u32 %v4308_v53, %v3846_v1  ;;  %v3909_v18 = vor.u32 %v4325_v45, %v3908_v15 }
 0x13d   : > { %v1769_v6 = vpop.f32.mrf.mxu0  ;;  %v1768_v40 = vadd.f32 %v1767_v59, %v1755_v31  ;;  %v4332_v31 = vld [vmem:[#allocation6 + $0x1d4] sm:$0xf] }
 0x13e   : > { %2366 = vmatmul.bf16.vlgmr.msrb.gmra.mxu1 %v1951_v8  ;;  %v4306_v6 = vld [vmem:[#allocation6 + $0x104] sm:$0xf] }
 0x13f   : > { %v1780_v11 = vpop.f32.mrf.mxu2  ;;  %2424 = vmatpush.bf16.msra.mxu2 %v3889_v23 }
 0x140   : > { %v1781_v47 = vadd.f32 %v1780_v11, %v1768_v40  ;;  %2387 = vmatpush.bf16.msra.mxu0 %v3933_v54  ;;  %v3838_v11 = vld [vmem:[#allocation6 + $0x108] sm:$0xf0]  ;;  %v4330_v40 = vld [vmem:[#allocation6 + $0x1c4] sm:$0xf] }
 0x141   : > { %v3841_v13 = vor.u32 %v4306_v6, %v3838_v11 }
 0x142   : > { %v1756_v20 = vpop.f32.mrf.mxu3 }
 0x143   : > { %2425 = vmatpush.bf16.msra.mxu2 %v3881_v28  ;;  %v3900_v20 = vld [vmem:[#allocation6 + $0x180] sm:$0xf] }
 0x144   : > { %2388 = vmatpush.bf16.msra.mxu0 %v3925_v0  ;;  %v3901_v23 = vor.u32 %v4323_v21, %v3900_v20 }
 0x145   : > { %v1819_v25 = vpop.f32.mrf.mxu0 }
 0x147   : > { %v1782_v26 = vpop.f32.mrf.mxu2  ;;  %2426 = vmatpush.bf16.msra.mxu2 %v3873_v39  ;;  %v3945_v39 = vor.u32 %v4332_v31, %v3942_v32  ;;  %v4345_v32 = vld [vmem:[%s4976_s3 + $0x38] sm:$0xff] }
 0x148   : > { %2389 = vmatpush.bf16.msra.mxu0 %v3917_v10  ;;  %v561_v26 = vperm.slane %v4835_v27, 3  ;;  %2598 = vmatpush.bf16.msra.mxu3 %v4345_v32 }
 0x14b   : > { %2427 = vmatpush.bf16.msra.mxu2 %v3865_v37 }
 0x14c   : > { %2390 = vmatpush.bf16.msra.mxu0 %v3909_v18 }
 0x14d   : > { %v1821_v36 = vpop.f32.mrf.mxu0 }
 0x14e   : > { %2418 = vmatmul.bf16.vlgmr.msra.gmra.mxu1 %v1951_v8 }
 0x14f   : > { %2428 = vmatpush.bf16.msra.mxu2 %v3857_v42  ;;  %v3918_v42 = vld [vmem:[#allocation6 + $0x1a8] sm:$0xf0] }
 0x150   : > { %2391 = vmatpush.bf16.msra.mxu0 %v3901_v23 }
 0x153   : > { %2429 = vmatpush.bf16.msra.mxu2 %v3849_v2 }
 0x154   : > { %v1793_v51 = vpop.f32.mrf.mxu1  ;;  %2436 = vmatpush.bf16.msrb.mxu0 %v3961_v19 }
 0x155   : > { %v1794_v50 = vadd.f32 %v1793_v51, %v1781_v47  ;;  %v3934_v51 = vld [vmem:[#allocation6 + $0x1c8] sm:$0xf0] }
 0x156   : > { %v3937_v27 = vor.u32 %v4330_v40, %v3934_v51  ;;  %v4352_v51 = vld [vmem:[%s4976_s3 + $0x70] sm:$0xff] }
 0x157   : > { %2430 = vmatpush.bf16.msra.mxu2 %v3841_v13 }
 0x15a   : > { %v1806_v58 = vpop.f32.mrf.mxu3 }
 0x15b   : > { %v4867_v52 = vpop.f32.mrf.mxu0  ;;  %v1807_v59 = vadd.f32 %v1806_v58, %v1794_v50  ;;  %v3926_v50 = vld [vmem:[#allocation6 + $0x1b8] sm:$0xf0]  ;;  %v4326_v58 = vld [vmem:[#allocation6 + $0x1a4] sm:$0xf] }
 0x15c   : > { %v1795_v35 = vpop.f32.mrf.mxu1  ;;  %v3929_v54 = vor.u32 %v4328_v49, %v3926_v50  ;;  %v4347_v50 = vld [vmem:[%s4976_s3 + $0x48] sm:$0xff] }
 0x15d   : > { %v1820_v62 = vadd.f32 %v1819_v25, %v1807_v59  ;;  %v3950_v25 = vld [vmem:[#allocation6 + $0x1e8] sm:$0xf0]  ;;  %v3921_v59 = vor.u32 %v4326_v58, %v3918_v42  ;;  %v3910_v35 = vld [vmem:[#allocation6 + $0x198] sm:$0xf0]  ;;  %v4346_v58 = vld [vmem:[%s4976_s3 + $0x40] sm:$0xff] }
 0x15e   : > { %v3953_v28 = vor.u32 %v4334_v7, %v3950_v25 }
 0x15f   : > { %v1832_v63 = vpop.f32.mrf.mxu2  ;;  %v1920_v3 = vmul.f32 0.044715, %v1820_v62  ;;  %v1916_v29 = vmul.f32 0.5, %v1820_v62 }
 0x160   : > { %v1833_v33 = vadd.f32 %v1832_v63, %v561_v26  ;;  %2437 = vmatpush.bf16.msrb.mxu0 %v3953_v28 }
 0x161   : > { %v1924_v8 = vmul.f32 %v1920_v3, %v1820_v62  ;;  %v4322_v3 = vld [vmem:[#allocation6 + $0x184] sm:$0xf] }
 0x162   : > { %v1808_v12 = vpop.f32.mrf.mxu3  ;;  %v1846_v41 = vadd.f32 %v4867_v52, %v1833_v33  ;;  %v4324_v52 = vld [vmem:[#allocation6 + $0x194] sm:$0xf]  ;;  %v3905_v6 = vor.u32 %v4322_v3, %v3902_v4  ;;  %v4344_v33 = vld [vmem:[%s4976_s3 + $0x30] sm:$0xff] }
 0x163   : > { %v1847_v9 = vpop.f32.mrf.mxu0  ;;  %v1928_v14 = vmul.f32 %v1924_v8, %v1820_v62  ;;  %v3913_v63 = vor.u32 %v4324_v52, %v3910_v35  ;;  %2599 = vmatpush.bf16.msra.mxu3 %v4344_v33 }
 0x164   : > { %2438 = vmatpush.bf16.msrb.mxu0 %v3945_v39  ;;  %v4353_v39 = vld [vmem:[%s4976_s3 + $0x78] sm:$0xff] }
 0x165   : > { %v1932_v17 = vadd.f32 %v1928_v14, %v1820_v62  ;;  %2611 = vmatpush.bf16.msrb.mxu1 %v4353_v39 }
 0x167   : > { %v1834_v16 = vpop.f32.mrf.mxu2  ;;  %v1936_v55 = vmul.f32 0.7978846, %v1932_v17 }
 0x168   : > { %2439 = vmatpush.bf16.msrb.mxu0 %v3937_v27  ;;  %v4351_v27 = vld [vmem:[%s4976_s3 + $0x68] sm:$0xff] }
 0x169   : > { %4447 = vtanh.f32 %v1936_v55  ;;  %v2019_v55 = vld [vmem:[#allocation7 + $0x1] ss:$8 sm:$0x3]  ;;  %2612 = vmatpush.bf16.msrb.mxu1 %v4352_v51 }
 0x16a   : > { %v2021_v21 = vperm.slane %v2019_v55, 0  ;;  %v2022_v25 = vperm.slane %v2019_v55, 1  ;;  %v4357_v55 = vld [vmem:[%s4977_s4 + $0x18] sm:$0xff] }
 0x16c   : > { %2440 = vmatpush.bf16.msrb.mxu0 %v3929_v54 }
 0x16d   : > { %2613 = vmatpush.bf16.msrb.mxu1 %v4351_v27  ;;  %v4362_v27 = vld [vmem:[%s4978_s5] sm:$0xff] }
 0x16f   : > { %v4448_v34 = vpop.eup %4447 }
 0x170   : > { %v1944_v38 = vadd.f32 1.0, %v4448_v34  ;;  %2441 = vmatpush.bf16.msrb.mxu0 %v3921_v59 }
 0x172   : > { %v1948_v43 = vmul.f32 %v1944_v38, %v1916_v29  ;;  %v4342_v29 = vld [vmem:[%s4976_s3 + $0x20] sm:$0xff]  ;;  %v4341_v38 = vld [vmem:[%s4976_s3 + $0x18] sm:$0xff] }
 0x174   : > { %v1858_v36 = vpop.f32.mrf.mxu1  ;;  %v1952_v57 = vpack.c.bf16 %v1948_v43, %v1948_v43  ;;  %2442 = vmatpush.bf16.msrb.mxu0 %v3913_v63 }
 0x175   : > { %v1859_v44 = vadd.f32 %v1858_v36, %v1846_v41  ;;  %v4343_v36 = vld [vmem:[%s4976_s3 + $0x28] sm:$0xff]  ;;  %v4340_v41 = vld [vmem:[%s4976_s3 + $0x10] sm:$0xff] }
 0x176   : > { %2379 = vmatmul.bf16.vlgmr.msrb.gmra.mxu2 %v1952_v57  ;;  %2600 = vmatpush.bf16.msra.mxu3 %v4343_v36 }
 0x178   : > { %2443 = vmatpush.bf16.msrb.mxu0 %v3905_v6 }
 0x17a   : > { %v1871_v46 = vpop.f32.mrf.mxu3  ;;  %v1897_v37 = vpop.f32.mrf.mxu0  ;;  %2601 = vmatpush.bf16.msra.mxu3 %v4342_v29 }
 0x17b   : > { %v1872_v47 = vadd.f32 %v1871_v46, %v1859_v44  ;;  %v4338_v44 = vld [vmem:[%s4976_s3] sm:$0xff] }
 0x17c   : > { %v1860_v48 = vpop.f32.mrf.mxu1  ;;  %v4350_v46 = vld [vmem:[%s4976_s3 + $0x60] sm:$0xff] }
 0x17d   : > { %2614 = vmatpush.bf16.msrb.mxu1 %v4350_v46  ;;  %v4348_v48 = vld [vmem:[%s4976_s3 + $0x50] sm:$0xff] }
 0x17e   : > { %2602 = vmatpush.bf16.msra.mxu3 %v4341_v38 }
 0x17f   : > { %v1884_v30 = vpop.f32.mrf.mxu2 }
 0x180   : > { %v1885_v56 = vadd.f32 %v1884_v30, %v1872_v47  ;;  %v4349_v47 = vld [vmem:[%s4976_s3 + $0x58] sm:$0xff] }
 0x181   : > { %2615 = vmatpush.bf16.msrb.mxu1 %v4349_v47 }
 0x182   : > { %v1873_v60 = vpop.f32.mrf.mxu3  ;;  %v1899_v61 = vpop.f32.mrf.mxu0  ;;  %v1898_v53 = vadd.f32 %v1897_v37, %v1885_v56  ;;  %2603 = vmatpush.bf16.msra.mxu3 %v4340_v41  ;;  %v4365_v41 = vld [vmem:[%s4978_s5 + $0x18] sm:$0xff] }
 0x184   : > { %v1910_v62 = vpop.f32.mrf.mxu1 }
 0x185   : > { %v1911_v0 = vadd.f32 %v1910_v62, %v1898_v53  ;;  %2616 = vmatpush.bf16.msrb.mxu1 %v4348_v48 }
 0x186   : > { %2431 = vmatmul.bf16.vlgmr.msra.gmra.mxu2 %v1952_v57  ;;  %v4339_v57 = vld [vmem:[%s4976_s3 + $0x8] sm:$0xff] }
 0x187   : > { %v1886_v1 = vpop.f32.mrf.mxu2  ;;  %v1921_v2 = vmul.f32 0.044715, %v1911_v0  ;;  %v1917_v13 = vmul.f32 0.5, %v1911_v0  ;;  %2604 = vmatpush.bf16.msra.mxu3 %v4339_v57  ;;  %v4363_v57 = vld [vmem:[%s4978_s5 + $0x8] sm:$0xff] }
 0x189   : > { %v1925_v5 = vmul.f32 %v1921_v2, %v1911_v0  ;;  %2617 = vmatpush.bf16.msrb.mxu1 %v4347_v50 }
 0x18b   : > { %v1929_v8 = vmul.f32 %v1925_v5, %v1911_v0  ;;  %2605 = vmatpush.bf16.msra.mxu3 %v4338_v44  ;;  %v2650_v44 = vld [vmem:[#allocation7 + $0x3] ss:$0 sm:$0xff] }
 0x18c   : > { %v1912_v9 = vpop.f32.mrf.mxu1 }
 0x18d   : > { %v1933_v10 = vadd.f32 %v1929_v8, %v1911_v0  ;;  %2618 = vmatpush.bf16.msrb.mxu1 %v4346_v58 }
 0x18f   : > { %v1937_v11 = vmul.f32 0.7978846, %v1933_v10 }
 0x191   : > { %4449 = vtanh.f32 %v1937_v11 }
 0x197   : > { %v4450_v12 = vpop.eup %4449 }
 0x198   : > { %v1945_v14 = vadd.f32 1.0, %v4450_v12 }
 0x19a   : > { %v1949_v15 = vmul.f32 %v1945_v14, %v1917_v13 }
 0x19c   : > { %v1953_v45 = vpack.c.bf16 %v1949_v15, %v1949_v15  ;;  %v2354_v16 = vpop.f32.mrf.mxu3 }
 0x19d   : > { %v2355_v22 = vadd.f32 %v2354_v16, %v2021_v21  ;;  %v4360_v16 = vld [vmem:[%s4977_s4 + $0x30] sm:$0xff]  ;;  %v4355_v21 = vld [vmem:[%s4977_s4 + $0x8] sm:$0xff] }
 0x19e   : > { %2392 = vmatmul.bf16.vlgmr.msra.gmra.mxu0 %v1953_v45 }
 0x19f   : > { %2763 = vmatpush.bf16.msra.mxu0 %v4365_v41 }
 0x1a4   : > { %v2356_v17 = vpop.f32.mrf.mxu3 }
 0x1a5   : > { %v4359_v17 = vld [vmem:[%s4977_s4 + $0x28] sm:$0xff] }
 0x1ae   : > { %2444 = vmatmul.bf16.vlgmr.msrb.gmra.mxu0 %v1953_v45  ;;  %v4361_v45 = vld [vmem:[%s4977_s4 + $0x38] sm:$0xff] }
 0x1af   : > { %2699 = vmatpush.bf16.msrb.mxu2 %v4361_v45 }
 0x1b3   : > { %2700 = vmatpush.bf16.msrb.mxu2 %v4360_v16 }
 0x1b7   : > { %2701 = vmatpush.bf16.msrb.mxu2 %v4359_v17 }
 0x1ba   : > { %v2406_v18 = vpop.f32.mrf.mxu3 }
 0x1bb   : > { %v2367_v23 = vpop.f32.mrf.mxu1  ;;  %v2407_v26 = vadd.f32 %v2406_v18, %v2022_v25  ;;  %v4358_v18 = vld [vmem:[%s4977_s4 + $0x20] sm:$0xff] }
 0x1bc   : > { %v2368_v24 = vadd.f32 %v2367_v23, %v2355_v22  ;;  %2702 = vmatpush.bf16.msrb.mxu2 %v4358_v18  ;;  %v4354_v22 = vld [vmem:[%s4977_s4] sm:$0xff] }
 0x1c0   : > { %2703 = vmatpush.bf16.msrb.mxu2 %v4357_v55 }
 0x1c2   : > { %v2408_v20 = vpop.f32.mrf.mxu3 }
 0x1c3   : > { %v2369_v7 = vpop.f32.mrf.mxu1  ;;  %v4356_v20 = vld [vmem:[%s4977_s4 + $0x10] sm:$0xff] }
 0x1c4   : > { %2704 = vmatpush.bf16.msrb.mxu2 %v4356_v20 }
 0x1c8   : > { %2705 = vmatpush.bf16.msrb.mxu2 %v4355_v21 }
 0x1cb   : > { %v2419_v19 = vpop.f32.mrf.mxu1 }
 0x1cc   : > { %v2420_v28 = vadd.f32 %v2419_v19, %v2407_v26  ;;  %2706 = vmatpush.bf16.msrb.mxu2 %v4354_v22 }
 0x1d3   : > { %v2421_v31 = vpop.f32.mrf.mxu1 }
 0x1f9   : > { %v2380_v34 = vpop.f32.mrf.mxu2 }
 0x1fa   : > { %v2381_v30 = vadd.f32 %v2380_v34, %v2368_v24  ;;  %v2501_v24 = vld [vmem:[#allocation7 + $0x2] ss:$0 sm:$0xff] }
 0x201   : > { %v2382_v40 = vpop.f32.mrf.mxu2 }
 0x209   : > { %v2432_v43 = vpop.f32.mrf.mxu2 }
 0x20a   : > { %v2433_v61 = vadd.f32 %v2432_v43, %v2420_v28  ;;  %v4364_v43 = vld [vmem:[%s4978_s5 + $0x10] sm:$0xff] }
 0x20b   : > { %2764 = vmatpush.bf16.msra.mxu0 %v4364_v43 }
 0x20f   : > { %2765 = vmatpush.bf16.msra.mxu0 %v4363_v57 }
 0x211   : > { %v2434_v37 = vpop.f32.mrf.mxu2 }
 0x213   : > { %2766 = vmatpush.bf16.msra.mxu0 %v4362_v27 }
 0x21b   : > { %v2393_v49 = vpop.f32.mrf.mxu0 }
 0x21c   : > { %v2394_v54 = vadd.f32 %v2393_v49, %v2381_v30 }
 0x21e   : > { %v2451_v56 = vmul.f32 0.044715, %v2394_v54  ;;  %v2449_v1 = vmul.f32 0.5, %v2394_v54 }
 0x220   : > { %v2453_v42 = vmul.f32 %v2451_v56, %v2394_v54 }
 0x222   : > { %v2455_v52 = vmul.f32 %v2453_v42, %v2394_v54 }
 0x223   : > { %v2395_v59 = vpop.f32.mrf.mxu0 }
 0x224   : > { %v2457_v35 = vadd.f32 %v2455_v52, %v2394_v54 }
 0x226   : > { %v2459_v60 = vmul.f32 0.7978846, %v2457_v35  ;;  %v2730_v35 = vld [vmem:[#allocation7 + $0x4] ss:$0 sm:$0xff] }
 0x228   : > { %4451 = vtanh.f32 %v2459_v60 }
 0x22b   : > { %v2445_v53 = vpop.f32.mrf.mxu0 }
 0x22c   : > { %v2446_v62 = vadd.f32 %v2445_v53, %v2433_v61 }
 0x22e   : > { %v4452_v63 = vpop.eup %4451  ;;  %v2452_v0 = vmul.f32 0.044715, %v2446_v62  ;;  %v2450_v12 = vmul.f32 0.5, %v2446_v62 }
 0x22f   : > { %v2463_v2 = vadd.f32 1.0, %v4452_v63 }
 0x230   : > { %v2454_v3 = vmul.f32 %v2452_v0, %v2446_v62 }
 0x231   : > { %v2465_v4 = vmul.f32 %v2463_v2, %v2449_v1 }
 0x232   : > { %v2456_v5 = vmul.f32 %v2454_v3, %v2446_v62 }
 0x233   : > { %v2447_v6 = vpop.f32.mrf.mxu0  ;;  %v2467_v8 = vpack.c.bf16 %v2465_v4, %v2465_v4 }
 0x234   : > { %v2458_v9 = vadd.f32 %v2456_v5, %v2446_v62 }
 0x235   : > { %2606 = vmatmul.bf16.vlgmr.msra.gmra.mxu3 %v2467_v8 }
 0x236   : > { %v2460_v10 = vmul.f32 0.7978846, %v2458_v9  ;;  %v2782_v9 = vld [vmem:[#allocation7 + $0x6] ss:$0 sm:$0xff] }
 0x238   : > { %4453 = vtanh.f32 %v2460_v10 }
 0x23e   : > { %v4454_v11 = vpop.eup %4453 }
 0x23f   : > { %v2464_v13 = vadd.f32 1.0, %v4454_v11 }
 0x241   : > { %v2466_v14 = vmul.f32 %v2464_v13, %v2450_v12  ;;  %v2789_v13 = vld [vmem:[#allocation7 + $0x5] ss:$0 sm:$0xff] }
 0x243   : > { %v2468_v15 = vpack.c.bf16 %v2466_v14, %v2466_v14 }
 0x245   : > { %2619 = vmatmul.bf16.vlgmr.msrb.gmra.mxu1 %v2468_v15 }
 0x2b8   : > { %v2607_v23 = vpop.f32.mrf.mxu3 }
 0x2b9   : > { %v2608_v25 = vadd.f32 %v2607_v23, %v2501_v24 }
 0x2c0   : > { %v2609_v7 = vpop.f32.mrf.mxu3 }
 0x2c2   : > { %v2620_v26 = vpop.f32.mrf.mxu1 }
 0x2c3   : > { %v2621_v19 = vadd.f32 %v2620_v26, %v2608_v25 }
 0x2c5   : > { %v2625_v28 = vmul.f32 0.044715, %v2621_v19  ;;  %v2624_v38 = vmul.f32 0.5, %v2621_v19 }
 0x2c7   : > { %v2626_v31 = vmul.f32 %v2625_v28, %v2621_v19 }
 0x2c9   : > { %v2627_v32 = vmul.f32 %v2626_v31, %v2621_v19 }
 0x2ca   : > { %v2622_v33 = vpop.f32.mrf.mxu1 }
 0x2cb   : > { %v2628_v34 = vadd.f32 %v2627_v32, %v2621_v19 }
 0x2cd   : > { %v2629_v36 = vmul.f32 0.7978846, %v2628_v34 }
 0x2cf   : > { %4455 = vtanh.f32 %v2629_v36 }
 0x2d5   : > { %v4456_v29 = vpop.eup %4455 }
 0x2d6   : > { %v2631_v39 = vadd.f32 1.0, %v4456_v29 }
 0x2d8   : > { %v2632_v40 = vmul.f32 %v2631_v39, %v2624_v38 }
 0x2da   : > { %v2633_v51 = vpack.c.bf16 %v2632_v40, %v2632_v40 }
 0x2dc   : > { %2707 = vmatmul.bf16.vlgmr.msrb.gmra.mxu2 %v2633_v51 }
 0x35f   : > { %v2708_v46 = vpop.f32.mrf.mxu2 }
 0x360   : > { %v2709_v37 = vadd.f32 %v2708_v46, %v2650_v44 }
 0x362   : > { %v2713_v47 = vmul.f32 0.044715, %v2709_v37  ;;  %v2712_v58 = vmul.f32 0.5, %v2709_v37 }
 0x364   : > { %v2714_v48 = vmul.f32 %v2713_v47, %v2709_v37 }
 0x366   : > { %v2715_v30 = vmul.f32 %v2714_v48, %v2709_v37 }
 0x367   : > { %v2710_v49 = vpop.f32.mrf.mxu2 }
 0x368   : > { %v2716_v50 = vadd.f32 %v2715_v30, %v2709_v37 }
 0x36a   : > { %v2717_v54 = vmul.f32 0.7978846, %v2716_v50 }
 0x36c   : > { %4457 = vtanh.f32 %v2717_v54 }
 0x372   : > { %v4458_v56 = vpop.eup %4457 }
 0x373   : > { %v2719_v42 = vadd.f32 1.0, %v4458_v56 }
 0x375   : > { %v2720_v52 = vmul.f32 %v2719_v42, %v2712_v58 }
 0x377   : > { %v2721_v59 = vpack.c.bf16 %v2720_v52, %v2720_v52 }
 0x379   : > { %4074 = vmatmul.msk.bf16.vlgmr.msra.gmra.mxu0 %vm2755_vm1, %v2721_v59 }
 0x3f6   : > { %v2768_v60 = vpop.f32.mrf.mxu0 }
 0x3f7   : > { %v2769_v61 = vadd.f32 %v2768_v60, %v2730_v35 }
 0x3f9   : > { %v2773_v53 = vmul.f32 0.044715, %v2769_v61  ;;  %v2772_v4 = vmul.f32 0.5, %v2769_v61 }
 0x3fb   : > { %v2774_v62 = vmul.f32 %v2773_v53, %v2769_v61 }
 0x3fd   : > { %v2775_v63 = vmul.f32 %v2774_v62, %v2769_v61 }
 0x3fe   : > { %v2770_v0 = vpop.f32.mrf.mxu0 }
 0x3ff   : > { %v2776_v1 = vadd.f32 %v2775_v63, %v2769_v61 }
 0x401   : > { %v2777_v2 = vmul.f32 0.7978846, %v2776_v1 }
 0x403   : > { %4459 = vtanh.f32 %v2777_v2 }
 0x409   : > { %v4460_v3 = vpop.eup %4459 }
 0x40a   : > { %v2779_v5 = vadd.f32 1.0, %v4460_v3 }
 0x40c   : > { %v2780_v6 = vmul.f32 %v2779_v5, %v2772_v4 }
 0x40e   : > { %v2781_v8 = vpack.c.bf16 %v2780_v6, %v2780_v6 }
 0x410   : > { %v2783_v10 = vunpack.c.l.bf16 %v2781_v8 }
 0x412   : > { %v2784_v11 = vmul.f32 %v2783_v10, %v2782_v9 }
 0x414   : > { %v2786_v12 = vsel %vm2785_vm2, %v2784_v11, 0.0 }
 0x415   : > { %2787 = vadd.xlane.f32.xlu0 %v2786_v12 }
 0x488   : > { %v2788_v14 = vpop.xlane.xlu0 %2787 }
 0x489   : > { %v2790_v15 = vadd.f32 %v2789_v13, %v2788_v14 }
 0x48b   : > { %v4075_v45 = vmul.f32 -1.442695, %v2790_v15 }
 0x48d   : > { %4461 = vpow2.f32 %v4075_v45 }
 0x493   : > { %v4462_v16 = vpop.eup %4461 }
 0x494   : > { %v2794_v17 = vadd.f32 1.0, %v4462_v16 }
 0x496   : > { %4463 = vrcp.f32 %v2794_v17  ;;  %v2806_v21 = vand.u32 2147483648, %v2794_v17  ;;  %v2804_v23 = vand.u32 2147483647, %v2794_v17  ;;  %vm2800_vm4 = vweird.f32 %v2794_v17 }
 0x498   : > { %v2807_v7 = vor.u32 1.1754944e-38, %v2806_v21  ;;  %vm2805_vm7 = vcmp.eq.f32.partialorder %v2804_v23, 8.507059e+37 }
 0x49c   : > { %v4464_v18 = vpop.eup %4463 }
 0x49d   : > { %v2796_v55 = vmul.f32 %v4464_v18, %v2794_v17  ;;  %vm2801_vm3 = vweird.f32 %v4464_v18 }
 0x49e   : > { %vm2802_vm5 = vmor %vm2800_vm4, %vm2801_vm3 }
 0x49f   : > { %v2797_v20 = vsub.f32 1.0, %v2796_v55 }
 0x4a1   : > { %v2798_v22 = vmul.f32 %v4464_v18, %v2797_v20 }
 0x4a3   : > { %v2799_v24 = vadd.f32 %v4464_v18, %v2798_v22 }
 0x4a5   : > { %v2803_v25 = vsel %vm2802_vm5, %v4464_v18, %v2799_v24 }
 0x4a6   : > { %v2808_v26 = vsel %vm2805_vm7, %v2807_v7, %v2803_v25 }
 0x4a7   : > { %2811 = vst.msk [vmem:[%s344_s23] sm:$0xff] %vm2810_vm6, %v2808_v26 }
 0x4a8 PF: > { %p19_p3 = scmp.ge.s32.totalorder %s4730_s30, 4   ;;  %s4985_s24 = smov %s4619_s25 }
 0x4a9   : > { %s4986_s25 = smov %s4623_s26  ;;  %s4987_s26 = smov %s4741_s13 }
 0x4aa   : > { %s4988_s27 = smov %s4730_s30  ;;  %21 = sbr.rel (!%p19_p3) target bundleno = 5 (0x5), region = 101 }
 0x4af   :  { %2831 = vsyncpa [#allocation3], 1 }
 0x4b0   :  { %2833 = vsyncpa [#allocation3 + $0x1], 1 }
 0x4b1   :  { %2834 = vsyncpa [#allocation5], 1 }
 0x4b2   :  { %2835 = vsyncpa [#allocation8], 1 }

</bundles_post_ra>
